<compile_context>
chip_gen: v6e
topology: v6e:2x2x1
jax: 0.10.0
libtpu: 0.0.40
codegen_flags: <defaults>
</compile_context>

<pallas_src>
import jax
import jax.numpy as jnp
from jax import lax
from jax.experimental import pallas as pl
from jax.experimental.pallas import tpu as pltpu


# -------------------- Fused kernel: BiLSTM + keyword gather + head --------------------
def _bilstm_head_kernel(idx_ref,                 # (Bp, 3) int32, SMEM (scalar prefetch)
                        x_ref,                   # (T*Bp, E) f32, time-major, batch-padded
                        wih_ref,                 # (E, 8H)  [fwd 4H | bwd 4H], g-cols pre-scaled x2
                        b_ref,                   # (1, 8H)  combined b_ih+b_hh, g-cols pre-scaled x2
                        whh_f_ref, whh_b_ref,    # (H, 4H) each, g-cols pre-scaled x2
                        w1t_ref, b1_ref,         # (2H, 2H), (1, 2H)
                        w2_ref, b2_ref,          # (1, 2H),  (1, 1)
                        logits_ref, pred_ref,    # (Bp, 1) each
                        rec_ref, sv_ref):        # VMEM scratch: (T, Bp, 2H), (Bp, 2H)
    T, Bp, _ = rec_ref.shape
    H = whh_f_ref.shape[0]
    G = 4 * H

    # ---- hoisted input projection for both directions (one big MXU matmul + one bias add) ----
    xw = jnp.dot(x_ref[...], wih_ref[...], preferred_element_type=jnp.float32) + b_ref[...]

    whh_f = whh_f_ref[...]
    whh_b = whh_b_ref[...]

    def cell(xw_t, h, c, whh):
        # gate pre-activations (i, f, g, o); g-gate columns already scaled by 2.
        gates = xw_t + jnp.dot(h, whh, preferred_element_type=jnp.float32)   # (Bp, 4H)
        s = jax.nn.sigmoid(gates)             # single full-width EUP pass over all 4 gates
        i_g = s[:, 0:H]
        f_g = s[:, H:2 * H]
        g_g = 2.0 * s[:, 2 * H:3 * H] - 1.0   # tanh(g) = 2*sigmoid(2g) - 1
        o_g = s[:, 3 * H:4 * H]
        c_new = f_g * c + i_g * g_g
        h_new = o_g * jnp.tanh(c_new)
        return h_new, c_new

    # ---- forward direction (fully unrolled: T static & small) ----
    h = jnp.zeros((Bp, H), jnp.float32)
    c = jnp.zeros((Bp, H), jnp.float32)
    for t in range(T):
        h, c = cell(xw[t * Bp:(t + 1) * Bp, 0:G], h, c, whh_f)
        rec_ref[t, :, 0:H] = h

    # ---- backward direction (fully unrolled) ----
    h = jnp.zeros((Bp, H), jnp.float32)
    c = jnp.zeros((Bp, H), jnp.float32)
    for s_i in range(T):
        t = T - 1 - s_i
        h, c = cell(xw[t * Bp:(t + 1) * Bp, G:2 * G], h, c, whh_b)
        rec_ref[t, :, H:2 * H] = h

    # ---- in-kernel keyword gather: sv[b] = rec[idx[b,0], b, :] * rec[idx[b,2], b, :] ----
    for b in range(Bp):
        t1 = idx_ref[b, 0]
        t2 = idx_ref[b, 2]
        r1 = rec_ref[t1]            # (Bp, 2H) slab load at dynamic time index (SMEM scalar)
        r2 = rec_ref[t2]
        sv_ref[b:b + 1, :] = r1[b:b + 1, :] * r2[b:b + 1, :]

    # ---- classifier head ----
    sv = sv_ref[...]                                                          # (Bp, 2H)
    hid = jnp.dot(sv, w1t_ref[...], preferred_element_type=jnp.float32) + b1_ref[...]
    hid = jnp.where(hid > 0, hid, jnp.float32(0.01) * hid)                    # F.leaky_relu (0.01)
    # logits: VPU multiply + lane reduction (avoid an N=1 MXU push).
    logits = jnp.sum(hid * w2_ref[...], axis=-1, keepdims=True) + b2_ref[...]  # (Bp, 1)
    logits_ref[...] = logits
    pred_ref[...] = jax.nn.sigmoid(logits)


def fused_forward_pallas(idx, x_flat, kp, T, Bp):
    H = kp["whh_f"].shape[0]
    vmem = pl.BlockSpec(memory_space=pltpu.MemorySpace.VMEM)
    grid_spec = pltpu.PrefetchScalarGridSpec(
        num_scalar_prefetch=1,            # indices_keyword -> SMEM
        grid=(1,),
        in_specs=[vmem] * 9,
        out_specs=(vmem, vmem),
        scratch_shapes=[pltpu.VMEM((T, Bp, 2 * H), jnp.float32),   # BiLSTM hidden states (never hit HBM)
                        pltpu.VMEM((Bp, 2 * H), jnp.float32)],     # gathered summary vectors
    )
    logits, pred = pl.pallas_call(
        _bilstm_head_kernel,
        out_shape=(jax.ShapeDtypeStruct((Bp, 1), jnp.float32),
                   jax.ShapeDtypeStruct((Bp, 1), jnp.float32)),
        grid_spec=grid_spec,
        compiler_params=pltpu.CompilerParams(dimension_semantics=("arbitrary",)),
    )(idx, x_flat, kp["wih_all"], kp["b_all"], kp["whh_f"], kp["whh_b"],
      kp["w1_t"], kp["b1"], kp["w2_row"], kp["b2"])
    return logits, pred


# ------------------------------ Param prep (done once) --------------------------------
def prepare_kernel_params(params):
    """Transposed-weight params -> kernel params: concat directions, pre-scale g-gate cols by 2."""
    H = params["whh_f_t"].shape[0]

    def scale_g(w):   # scale the g-gate block (columns [2H:3H] of the 4H gate axis) by 2
        return jnp.concatenate([w[..., :2 * H], 2.0 * w[..., 2 * H:3 * H], w[..., 3 * H:]], axis=-1)

    return {
        "embedding": params["embedding"],
        "wih_all": jnp.concatenate([scale_g(params["wih_f_t"]), scale_g(params["wih_b_t"])], axis=-1),
        "b_all":   jnp.concatenate([scale_g(params["b_f"]),     scale_g(params["b_b"])],     axis=-1),
        "whh_f":   scale_g(params["whh_f_t"]),
        "whh_b":   scale_g(params["whh_b_t"]),
        "w1_t":    params["w1_t"],
        "b1":      params["b1"],
        "w2_row":  params["w2_t"].T,     # (1, 2H)
        "b2":      params["b2"],
    }


# --------------------------------- Full forward ---------------------------------------
@jax.jit
def student_model_forward(kparams, X, X_length, indices_keyword):
    del X_length  # unused, as in the PyTorch forward (no pack_padded_sequence)
    B, T = X.shape
    Bp = ((B + 7) // 8) * 8          # pad batch to full sublane groups

    # TODO(synk): vocab embedding lookup stays in XLA (data-dependent HBM row gather over a
    # potentially VMEM-exceeding table); everything downstream runs in one fused Pallas kernel.
    emb = jnp.take(kparams["embedding"], X, axis=0)            # (B, T, E)
    x = jnp.transpose(emb, (1, 0, 2))                          # (T, B, E) time-major
    x = jnp.pad(x, ((0, 0), (0, Bp - B), (0, 0)))              # (T, Bp, E)
    x_flat = x.reshape(T * Bp, x.shape[-1])                    # (T*Bp, E)

    idx = indices_keyword.astype(jnp.int32)
    idx = jnp.pad(idx, ((0, Bp - B), (0, 0)))                  # padded rows gather t=0 (harmless)

    logits, pred = fused_forward_pallas(idx, x_flat, kparams, T, Bp)
    return {"logits": logits[:B, 0], "pred": pred[:B, 0]}


# -------------------------------- JAX reference ---------------------------------------
def reference_forward(params, X, X_length, indices_keyword):
    del X_length
    B, T = X.shape
    H = params["whh_f_t"].shape[0]
    emb = jnp.take(params["embedding"], X, axis=0)

    def run_dir(xs, wih_t, whh_t, b):
        def cell(carry, x_t):
            h, c = carry
            g = x_t @ wih_t + h @ whh_t + b[0]
            i = jax.nn.sigmoid(g[:, 0:H]); f = jax.nn.sigmoid(g[:, H:2 * H])
            gg = jnp.tanh(g[:, 2 * H:3 * H]); o = jax.nn.sigmoid(g[:, 3 * H:4 * H])
            c = f * c + i * gg
            h = o * jnp.tanh(c)
            return (h, c), h
        h0 = jnp.zeros((B, H), jnp.float32)
        _, hs = lax.scan(cell, (h0, h0), xs)
        return hs  # (T, B, H)

    xs = jnp.transpose(emb, (1, 0, 2))
    hf = run_dir(xs, params["wih_f_t"], params["whh_f_t"], params["b_f"])
    hb = run_dir(xs[::-1], params["wih_b_t"], params["whh_b_t"], params["b_b"])[::-1]
    rec = jnp.transpose(jnp.concatenate([hf, hb], axis=-1), (1, 0, 2))
    flat = rec.reshape(B * T, 2 * H)
    offs = jnp.arange(B) * T
    sv = flat[indices_keyword[:, 0] + offs] * flat[indices_keyword[:, 2] + offs]
    hid = sv @ params["w1_t"] + params["b1"][0]
    hid = jnp.where(hid > 0, hid, 0.01 * hid)
    logits = (hid @ params["w2_t"] + params["b2"][0])[:, 0]
    return {"logits": logits, "pred": jax.nn.sigmoid(logits)}


# ------------------------------------ Driver ------------------------------------------
if __name__ == "__main__":
    B, T = 2, 8          # batch, sequence length
    V, E = 50, 32        # vocab size, embedding dim (vectors_store)
    H = 32               # LSTM hidden size (scaled-down n_hidden)

    key = jax.random.PRNGKey(0)
    keys = jax.random.split(key, 12)
    s = 0.1

    params = {
        "embedding": jax.random.normal(keys[0], (V, E), jnp.float32),
        # pre-transposed LSTM weights (PyTorch stores (4H, E)/(4H, H); we keep W^T)
        "wih_f_t": s * jax.random.normal(keys[1], (E, 4 * H), jnp.float32),
        "whh_f_t": s * jax.random.normal(keys[2], (H, 4 * H), jnp.float32),
        "b_f": s * jax.random.normal(keys[3], (1, 4 * H), jnp.float32),   # b_ih + b_hh
        "wih_b_t": s * jax.random.normal(keys[4], (E, 4 * H), jnp.float32),
        "whh_b_t": s * jax.random.normal(keys[5], (H, 4 * H), jnp.float32),
        "b_b": s * jax.random.normal(keys[6], (1, 4 * H), jnp.float32),
        # head: lin1 (2H -> 2H), linear_output (2H -> 1), stored transposed
        "w1_t": s * jax.random.normal(keys[7], (2 * H, 2 * H), jnp.float32),
        "b1": s * jax.random.normal(keys[8], (1, 2 * H), jnp.float32),
        "w2_t": s * jax.random.normal(keys[9], (2 * H, 1), jnp.float32),
        "b2": s * jax.random.normal(keys[10], (1, 1), jnp.float32),
    }
    kparams = prepare_kernel_params(params)   # one-time prep (direction concat + g-gate scaling)

    X = jax.random.randint(keys[11], (B, T), 0, V, dtype=jnp.int32)
    X_length = jnp.full((B,), T, dtype=jnp.int32)
    # indices_keyword: (B, 3) = [kw pos in sent1, SEP pos, kw pos in sent2]
    indices_keyword = jnp.array([[1, 3, 6], [0, 4, 7]], dtype=jnp.int32)

    out = student_model_forward(kparams, X, X_length, indices_keyword)
    jax.block_until_ready(out)

    ref = reference_forward(params, X, X_length, indices_keyword)
    assert jnp.allclose(out["logits"], ref["logits"], rtol=1e-3, atol=1e-3)
    assert jnp.allclose(out["pred"], ref["pred"], rtol=1e-3, atol=1e-3)

    print("KERNEL_OK")
</pallas_src>

<mosaic_0001>
module attributes {stable_mosaic.version = 11 : i64} {
  func.func @_bilstm_head_kernel(%arg0: i32, %arg1: memref<8x3xi32, #tpu.memory_space<smem>>, %arg2: memref<64x32xf32, #tpu.memory_space<vmem>>, %arg3: memref<32x256xf32, #tpu.memory_space<vmem>>, %arg4: memref<1x256xf32, #tpu.memory_space<vmem>>, %arg5: memref<32x128xf32, #tpu.memory_space<vmem>>, %arg6: memref<32x128xf32, #tpu.memory_space<vmem>>, %arg7: memref<64x64xf32, #tpu.memory_space<vmem>>, %arg8: memref<1x64xf32, #tpu.memory_space<vmem>>, %arg9: memref<1x64xf32, #tpu.memory_space<vmem>>, %arg10: memref<1x1xf32, #tpu.memory_space<vmem>>, %arg11: memref<8x1xf32, #tpu.memory_space<vmem>>, %arg12: memref<8x1xf32, #tpu.memory_space<vmem>>, %arg13: memref<8x8x64xf32, #tpu.memory_space<vmem>>, %arg14: memref<8x64xf32, #tpu.memory_space<vmem>>) attributes {dimension_semantics = [#tpu.dimension_semantics<arbitrary>], iteration_bounds = array<i64: 1>, scalar_prefetch = 1 : i64, scratch_operands = 2 : i64, tpu.core_type = #tpu.core_type<tc>, window_params = [{pipeline_mode = #tpu.pipeline_mode<synchronous>, transform_indices = @transform_0, window_bounds = array<i64: 64, 32>}, {pipeline_mode = #tpu.pipeline_mode<synchronous>, transform_indices = @transform_1, window_bounds = array<i64: 32, 256>}, {pipeline_mode = #tpu.pipeline_mode<synchronous>, transform_indices = @transform_2, window_bounds = array<i64: 1, 256>}, {pipeline_mode = #tpu.pipeline_mode<synchronous>, transform_indices = @transform_3, window_bounds = array<i64: 32, 128>}, {pipeline_mode = #tpu.pipeline_mode<synchronous>, transform_indices = @transform_4, window_bounds = array<i64: 32, 128>}, {pipeline_mode = #tpu.pipeline_mode<synchronous>, transform_indices = @transform_5, window_bounds = array<i64: 64, 64>}, {pipeline_mode = #tpu.pipeline_mode<synchronous>, transform_indices = @transform_6, window_bounds = array<i64: 1, 64>}, {pipeline_mode = #tpu.pipeline_mode<synchronous>, transform_indices = @transform_7, window_bounds = array<i64: 1, 64>}, {pipeline_mode = #tpu.pipeline_mode<synchronous>, transform_indices = @transform_8, window_bounds = array<i64: 1, 1>}, {pipeline_mode = #tpu.pipeline_mode<synchronous>, transform_indices = @transform_9, window_bounds = array<i64: 8, 1>}, {pipeline_mode = #tpu.pipeline_mode<synchronous>, transform_indices = @transform_10, window_bounds = array<i64: 8, 1>}]} {
    %c0 = arith.constant 0 : index
    %c0_0 = arith.constant 0 : index
    %0 = vector.load %arg2[%c0, %c0_0] : memref<64x32xf32, #tpu.memory_space<vmem>>, vector<64x32xf32>
    %c0_1 = arith.constant 0 : index
    %c0_2 = arith.constant 0 : index
    %1 = vector.load %arg3[%c0_1, %c0_2] : memref<32x256xf32, #tpu.memory_space<vmem>>, vector<32x256xf32>
    %cst = arith.constant dense<0.000000e+00> : vector<64x256xf32>
    %2 = tpu.matmul %0, %1, %cst {dimension_numbers = #tpu.dot_dimension_numbers<[1], [0], [0], [1], [0, 0, 1, 1], [], []>} : vector<64x32xf32>, vector<32x256xf32>, vector<64x256xf32> -> vector<64x256xf32>
    %c0_3 = arith.constant 0 : index
    %c0_4 = arith.constant 0 : index
    %3 = vector.load %arg4[%c0_3, %c0_4] : memref<1x256xf32, #tpu.memory_space<vmem>>, vector<1x256xf32>
    %4 = vector.broadcast %3 : vector<1x256xf32> to vector<64x256xf32>
    %5 = arith.addf %2, %4 : vector<64x256xf32>
    %c0_5 = arith.constant 0 : index
    %c0_6 = arith.constant 0 : index
    %6 = vector.load %arg5[%c0_5, %c0_6] : memref<32x128xf32, #tpu.memory_space<vmem>>, vector<32x128xf32>
    %c0_7 = arith.constant 0 : index
    %c0_8 = arith.constant 0 : index
    %7 = vector.load %arg6[%c0_7, %c0_8] : memref<32x128xf32, #tpu.memory_space<vmem>>, vector<32x128xf32>
    %cst_9 = arith.constant 0.000000e+00 : f32
    %8 = vector.broadcast %cst_9 : f32 to vector<8x32xf32>
    %cst_10 = arith.constant 0.000000e+00 : f32
    %9 = vector.broadcast %cst_10 : f32 to vector<8x32xf32>
    %10 = vector.extract_strided_slice %5 {offsets = [0, 0], sizes = [8, 128], strides = [1, 1]} : vector<64x256xf32> to vector<8x128xf32>
    %cst_11 = arith.constant dense<0.000000e+00> : vector<8x128xf32>
    %11 = tpu.matmul %8, %6, %cst_11 {dimension_numbers = #tpu.dot_dimension_numbers<[1], [0], [0], [1], [0, 0, 1, 1], [], []>} : vector<8x32xf32>, vector<32x128xf32>, vector<8x128xf32> -> vector<8x128xf32>
    %12 = arith.addf %10, %11 : vector<8x128xf32>
    %13 = arith.negf %12 : vector<8x128xf32>
    %14 = math.exp %13 : vector<8x128xf32>
    %cst_12 = arith.constant 1.000000e+00 : f32
    %15 = vector.broadcast %cst_12 : f32 to vector<8x128xf32>
    %16 = arith.addf %15, %14 : vector<8x128xf32>
    %17 = arith.divf %15, %16 : vector<8x128xf32>
    %18 = vector.extract_strided_slice %17 {offsets = [0, 0], sizes = [8, 32], strides = [1, 1]} : vector<8x128xf32> to vector<8x32xf32>
    %19 = vector.extract_strided_slice %17 {offsets = [0, 32], sizes = [8, 32], strides = [1, 1]} : vector<8x128xf32> to vector<8x32xf32>
    %20 = vector.extract_strided_slice %17 {offsets = [0, 64], sizes = [8, 32], strides = [1, 1]} : vector<8x128xf32> to vector<8x32xf32>
    %cst_13 = arith.constant 2.000000e+00 : f32
    %21 = vector.broadcast %cst_13 : f32 to vector<8x32xf32>
    %22 = arith.mulf %21, %20 : vector<8x32xf32>
    %cst_14 = arith.constant 1.000000e+00 : f32
    %23 = vector.broadcast %cst_14 : f32 to vector<8x32xf32>
    %24 = arith.subf %22, %23 : vector<8x32xf32>
    %25 = vector.extract_strided_slice %17 {offsets = [0, 96], sizes = [8, 32], strides = [1, 1]} : vector<8x128xf32> to vector<8x32xf32>
    %26 = arith.mulf %19, %9 : vector<8x32xf32>
    %27 = arith.mulf %18, %24 : vector<8x32xf32>
    %28 = arith.addf %26, %27 : vector<8x32xf32>
    %29 = math.tanh %28 : vector<8x32xf32>
    %30 = arith.mulf %25, %29 : vector<8x32xf32>
    %c0_15 = arith.constant 0 : index
    %c0_16 = arith.constant 0 : index
    %c0_17 = arith.constant 0 : index
    %31 = vector.load %arg13[%c0_15, %c0_16, %c0_17] : memref<8x8x64xf32, #tpu.memory_space<vmem>>, vector<1x8x32xf32>
    %32 = vector.shape_cast %31 : vector<1x8x32xf32> to vector<8x32xf32>
    %33 = vector.shape_cast %30 : vector<8x32xf32> to vector<1x8x32xf32>
    tpu.vector_store %arg13[%c0_15, %c0_16, %c0_17], %33 {strides = array<i32>} : memref<8x8x64xf32, #tpu.memory_space<vmem>>, vector<1x8x32xf32>,
    %34 = vector.extract_strided_slice %5 {offsets = [8, 0], sizes = [8, 128], strides = [1, 1]} : vector<64x256xf32> to vector<8x128xf32>
    %cst_18 = arith.constant dense<0.000000e+00> : vector<8x128xf32>
    %35 = tpu.matmul %30, %6, %cst_18 {dimension_numbers = #tpu.dot_dimension_numbers<[1], [0], [0], [1], [0, 0, 1, 1], [], []>} : vector<8x32xf32>, vector<32x128xf32>, vector<8x128xf32> -> vector<8x128xf32>
    %36 = arith.addf %34, %35 : vector<8x128xf32>
    %37 = arith.negf %36 : vector<8x128xf32>
    %38 = math.exp %37 : vector<8x128xf32>
    %cst_19 = arith.constant 1.000000e+00 : f32
    %39 = vector.broadcast %cst_19 : f32 to vector<8x128xf32>
    %40 = arith.addf %39, %38 : vector<8x128xf32>
    %41 = arith.divf %39, %40 : vector<8x128xf32>
    %42 = vector.extract_strided_slice %41 {offsets = [0, 0], sizes = [8, 32], strides = [1, 1]} : vector<8x128xf32> to vector<8x32xf32>
    %43 = vector.extract_strided_slice %41 {offsets = [0, 32], sizes = [8, 32], strides = [1, 1]} : vector<8x128xf32> to vector<8x32xf32>
    %44 = vector.extract_strided_slice %41 {offsets = [0, 64], sizes = [8, 32], strides = [1, 1]} : vector<8x128xf32> to vector<8x32xf32>
    %cst_20 = arith.constant 2.000000e+00 : f32
    %45 = vector.broadcast %cst_20 : f32 to vector<8x32xf32>
    %46 = arith.mulf %45, %44 : vector<8x32xf32>
    %cst_21 = arith.constant 1.000000e+00 : f32
    %47 = vector.broadcast %cst_21 : f32 to vector<8x32xf32>
    %48 = arith.subf %46, %47 : vector<8x32xf32>
    %49 = vector.extract_strided_slice %41 {offsets = [0, 96], sizes = [8, 32], strides = [1, 1]} : vector<8x128xf32> to vector<8x32xf32>
    %50 = arith.mulf %43, %28 : vector<8x32xf32>
    %51 = arith.mulf %42, %48 : vector<8x32xf32>
    %52 = arith.addf %50, %51 : vector<8x32xf32>
    %53 = math.tanh %52 : vector<8x32xf32>
    %54 = arith.mulf %49, %53 : vector<8x32xf32>
    %c1 = arith.constant 1 : index
    %c0_22 = arith.constant 0 : index
    %c0_23 = arith.constant 0 : index
    %55 = vector.load %arg13[%c1, %c0_22, %c0_23] : memref<8x8x64xf32, #tpu.memory_space<vmem>>, vector<1x8x32xf32>
    %56 = vector.shape_cast %55 : vector<1x8x32xf32> to vector<8x32xf32>
    %57 = vector.shape_cast %54 : vector<8x32xf32> to vector<1x8x32xf32>
    tpu.vector_store %arg13[%c1, %c0_22, %c0_23], %57 {strides = array<i32>} : memref<8x8x64xf32, #tpu.memory_space<vmem>>, vector<1x8x32xf32>,
    %58 = vector.extract_strided_slice %5 {offsets = [16, 0], sizes = [8, 128], strides = [1, 1]} : vector<64x256xf32> to vector<8x128xf32>
    %cst_24 = arith.constant dense<0.000000e+00> : vector<8x128xf32>
    %59 = tpu.matmul %54, %6, %cst_24 {dimension_numbers = #tpu.dot_dimension_numbers<[1], [0], [0], [1], [0, 0, 1, 1], [], []>} : vector<8x32xf32>, vector<32x128xf32>, vector<8x128xf32> -> vector<8x128xf32>
    %60 = arith.addf %58, %59 : vector<8x128xf32>
    %61 = arith.negf %60 : vector<8x128xf32>
    %62 = math.exp %61 : vector<8x128xf32>
    %cst_25 = arith.constant 1.000000e+00 : f32
    %63 = vector.broadcast %cst_25 : f32 to vector<8x128xf32>
    %64 = arith.addf %63, %62 : vector<8x128xf32>
    %65 = arith.divf %63, %64 : vector<8x128xf32>
    %66 = vector.extract_strided_slice %65 {offsets = [0, 0], sizes = [8, 32], strides = [1, 1]} : vector<8x128xf32> to vector<8x32xf32>
    %67 = vector.extract_strided_slice %65 {offsets = [0, 32], sizes = [8, 32], strides = [1, 1]} : vector<8x128xf32> to vector<8x32xf32>
    %68 = vector.extract_strided_slice %65 {offsets = [0, 64], sizes = [8, 32], strides = [1, 1]} : vector<8x128xf32> to vector<8x32xf32>
    %cst_26 = arith.constant 2.000000e+00 : f32
    %69 = vector.broadcast %cst_26 : f32 to vector<8x32xf32>
    %70 = arith.mulf %69, %68 : vector<8x32xf32>
    %cst_27 = arith.constant 1.000000e+00 : f32
    %71 = vector.broadcast %cst_27 : f32 to vector<8x32xf32>
    %72 = arith.subf %70, %71 : vector<8x32xf32>
    %73 = vector.extract_strided_slice %65 {offsets = [0, 96], sizes = [8, 32], strides = [1, 1]} : vector<8x128xf32> to vector<8x32xf32>
    %74 = arith.mulf %67, %52 : vector<8x32xf32>
    %75 = arith.mulf %66, %72 : vector<8x32xf32>
    %76 = arith.addf %74, %75 : vector<8x32xf32>
    %77 = math.tanh %76 : vector<8x32xf32>
    %78 = arith.mulf %73, %77 : vector<8x32xf32>
    %c2 = arith.constant 2 : index
    %c0_28 = arith.constant 0 : index
    %c0_29 = arith.constant 0 : index
    %79 = vector.load %arg13[%c2, %c0_28, %c0_29] : memref<8x8x64xf32, #tpu.memory_space<vmem>>, vector<1x8x32xf32>
    %80 = vector.shape_cast %79 : vector<1x8x32xf32> to vector<8x32xf32>
    %81 = vector.shape_cast %78 : vector<8x32xf32> to vector<1x8x32xf32>
    tpu.vector_store %arg13[%c2, %c0_28, %c0_29], %81 {strides = array<i32>} : memref<8x8x64xf32, #tpu.memory_space<vmem>>, vector<1x8x32xf32>,
    %82 = vector.extract_strided_slice %5 {offsets = [24, 0], sizes = [8, 128], strides = [1, 1]} : vector<64x256xf32> to vector<8x128xf32>
    %cst_30 = arith.constant dense<0.000000e+00> : vector<8x128xf32>
    %83 = tpu.matmul %78, %6, %cst_30 {dimension_numbers = #tpu.dot_dimension_numbers<[1], [0], [0], [1], [0, 0, 1, 1], [], []>} : vector<8x32xf32>, vector<32x128xf32>, vector<8x128xf32> -> vector<8x128xf32>
    %84 = arith.addf %82, %83 : vector<8x128xf32>
    %85 = arith.negf %84 : vector<8x128xf32>
    %86 = math.exp %85 : vector<8x128xf32>
    %cst_31 = arith.constant 1.000000e+00 : f32
    %87 = vector.broadcast %cst_31 : f32 to vector<8x128xf32>
    %88 = arith.addf %87, %86 : vector<8x128xf32>
    %89 = arith.divf %87, %88 : vector<8x128xf32>
    %90 = vector.extract_strided_slice %89 {offsets = [0, 0], sizes = [8, 32], strides = [1, 1]} : vector<8x128xf32> to vector<8x32xf32>
    %91 = vector.extract_strided_slice %89 {offsets = [0, 32], sizes = [8, 32], strides = [1, 1]} : vector<8x128xf32> to vector<8x32xf32>
    %92 = vector.extract_strided_slice %89 {offsets = [0, 64], sizes = [8, 32], strides = [1, 1]} : vector<8x128xf32> to vector<8x32xf32>
    %cst_32 = arith.constant 2.000000e+00 : f32
    %93 = vector.broadcast %cst_32 : f32 to vector<8x32xf32>
    %94 = arith.mulf %93, %92 : vector<8x32xf32>
    %cst_33 = arith.constant 1.000000e+00 : f32
    %95 = vector.broadcast %cst_33 : f32 to vector<8x32xf32>
    %96 = arith.subf %94, %95 : vector<8x32xf32>
    %97 = vector.extract_strided_slice %89 {offsets = [0, 96], sizes = [8, 32], strides = [1, 1]} : vector<8x128xf32> to vector<8x32xf32>
    %98 = arith.mulf %91, %76 : vector<8x32xf32>
    %99 = arith.mulf %90, %96 : vector<8x32xf32>
    %100 = arith.addf %98, %99 : vector<8x32xf32>
    %101 = math.tanh %100 : vector<8x32xf32>
    %102 = arith.mulf %97, %101 : vector<8x32xf32>
    %c3 = arith.constant 3 : index
    %c0_34 = arith.constant 0 : index
    %c0_35 = arith.constant 0 : index
    %103 = vector.load %arg13[%c3, %c0_34, %c0_35] : memref<8x8x64xf32, #tpu.memory_space<vmem>>, vector<1x8x32xf32>
    %104 = vector.shape_cast %103 : vector<1x8x32xf32> to vector<8x32xf32>
    %105 = vector.shape_cast %102 : vector<8x32xf32> to vector<1x8x32xf32>
    tpu.vector_store %arg13[%c3, %c0_34, %c0_35], %105 {strides = array<i32>} : memref<8x8x64xf32, #tpu.memory_space<vmem>>, vector<1x8x32xf32>,
    %106 = vector.extract_strided_slice %5 {offsets = [32, 0], sizes = [8, 128], strides = [1, 1]} : vector<64x256xf32> to vector<8x128xf32>
    %cst_36 = arith.constant dense<0.000000e+00> : vector<8x128xf32>
    %107 = tpu.matmul %102, %6, %cst_36 {dimension_numbers = #tpu.dot_dimension_numbers<[1], [0], [0], [1], [0, 0, 1, 1], [], []>} : vector<8x32xf32>, vector<32x128xf32>, vector<8x128xf32> -> vector<8x128xf32>
    %108 = arith.addf %106, %107 : vector<8x128xf32>
    %109 = arith.negf %108 : vector<8x128xf32>
    %110 = math.exp %109 : vector<8x128xf32>
    %cst_37 = arith.constant 1.000000e+00 : f32
    %111 = vector.broadcast %cst_37 : f32 to vector<8x128xf32>
    %112 = arith.addf %111, %110 : vector<8x128xf32>
    %113 = arith.divf %111, %112 : vector<8x128xf32>
    %114 = vector.extract_strided_slice %113 {offsets = [0, 0], sizes = [8, 32], strides = [1, 1]} : vector<8x128xf32> to vector<8x32xf32>
    %115 = vector.extract_strided_slice %113 {offsets = [0, 32], sizes = [8, 32], strides = [1, 1]} : vector<8x128xf32> to vector<8x32xf32>
    %116 = vector.extract_strided_slice %113 {offsets = [0, 64], sizes = [8, 32], strides = [1, 1]} : vector<8x128xf32> to vector<8x32xf32>
    %cst_38 = arith.constant 2.000000e+00 : f32
    %117 = vector.broadcast %cst_38 : f32 to vector<8x32xf32>
    %118 = arith.mulf %117, %116 : vector<8x32xf32>
    %cst_39 = arith.constant 1.000000e+00 : f32
    %119 = vector.broadcast %cst_39 : f32 to vector<8x32xf32>
    %120 = arith.subf %118, %119 : vector<8x32xf32>
    %121 = vector.extract_strided_slice %113 {offsets = [0, 96], sizes = [8, 32], strides = [1, 1]} : vector<8x128xf32> to vector<8x32xf32>
    %122 = arith.mulf %115, %100 : vector<8x32xf32>
    %123 = arith.mulf %114, %120 : vector<8x32xf32>
    %124 = arith.addf %122, %123 : vector<8x32xf32>
    %125 = math.tanh %124 : vector<8x32xf32>
    %126 = arith.mulf %121, %125 : vector<8x32xf32>
    %c4 = arith.constant 4 : index
    %c0_40 = arith.constant 0 : index
    %c0_41 = arith.constant 0 : index
    %127 = vector.load %arg13[%c4, %c0_40, %c0_41] : memref<8x8x64xf32, #tpu.memory_space<vmem>>, vector<1x8x32xf32>
    %128 = vector.shape_cast %127 : vector<1x8x32xf32> to vector<8x32xf32>
    %129 = vector.shape_cast %126 : vector<8x32xf32> to vector<1x8x32xf32>
    tpu.vector_store %arg13[%c4, %c0_40, %c0_41], %129 {strides = array<i32>} : memref<8x8x64xf32, #tpu.memory_space<vmem>>, vector<1x8x32xf32>,
    %130 = vector.extract_strided_slice %5 {offsets = [40, 0], sizes = [8, 128], strides = [1, 1]} : vector<64x256xf32> to vector<8x128xf32>
    %cst_42 = arith.constant dense<0.000000e+00> : vector<8x128xf32>
    %131 = tpu.matmul %126, %6, %cst_42 {dimension_numbers = #tpu.dot_dimension_numbers<[1], [0], [0], [1], [0, 0, 1, 1], [], []>} : vector<8x32xf32>, vector<32x128xf32>, vector<8x128xf32> -> vector<8x128xf32>
    %132 = arith.addf %130, %131 : vector<8x128xf32>
    %133 = arith.negf %132 : vector<8x128xf32>
    %134 = math.exp %133 : vector<8x128xf32>
    %cst_43 = arith.constant 1.000000e+00 : f32
    %135 = vector.broadcast %cst_43 : f32 to vector<8x128xf32>
    %136 = arith.addf %135, %134 : vector<8x128xf32>
    %137 = arith.divf %135, %136 : vector<8x128xf32>
    %138 = vector.extract_strided_slice %137 {offsets = [0, 0], sizes = [8, 32], strides = [1, 1]} : vector<8x128xf32> to vector<8x32xf32>
    %139 = vector.extract_strided_slice %137 {offsets = [0, 32], sizes = [8, 32], strides = [1, 1]} : vector<8x128xf32> to vector<8x32xf32>
    %140 = vector.extract_strided_slice %137 {offsets = [0, 64], sizes = [8, 32], strides = [1, 1]} : vector<8x128xf32> to vector<8x32xf32>
    %cst_44 = arith.constant 2.000000e+00 : f32
    %141 = vector.broadcast %cst_44 : f32 to vector<8x32xf32>
    %142 = arith.mulf %141, %140 : vector<8x32xf32>
    %cst_45 = arith.constant 1.000000e+00 : f32
    %143 = vector.broadcast %cst_45 : f32 to vector<8x32xf32>
    %144 = arith.subf %142, %143 : vector<8x32xf32>
    %145 = vector.extract_strided_slice %137 {offsets = [0, 96], sizes = [8, 32], strides = [1, 1]} : vector<8x128xf32> to vector<8x32xf32>
    %146 = arith.mulf %139, %124 : vector<8x32xf32>
    %147 = arith.mulf %138, %144 : vector<8x32xf32>
    %148 = arith.addf %146, %147 : vector<8x32xf32>
    %149 = math.tanh %148 : vector<8x32xf32>
    %150 = arith.mulf %145, %149 : vector<8x32xf32>
    %c5 = arith.constant 5 : index
    %c0_46 = arith.constant 0 : index
    %c0_47 = arith.constant 0 : index
    %151 = vector.load %arg13[%c5, %c0_46, %c0_47] : memref<8x8x64xf32, #tpu.memory_space<vmem>>, vector<1x8x32xf32>
    %152 = vector.shape_cast %151 : vector<1x8x32xf32> to vector<8x32xf32>
    %153 = vector.shape_cast %150 : vector<8x32xf32> to vector<1x8x32xf32>
    tpu.vector_store %arg13[%c5, %c0_46, %c0_47], %153 {strides = array<i32>} : memref<8x8x64xf32, #tpu.memory_space<vmem>>, vector<1x8x32xf32>,
    %154 = vector.extract_strided_slice %5 {offsets = [48, 0], sizes = [8, 128], strides = [1, 1]} : vector<64x256xf32> to vector<8x128xf32>
    %cst_48 = arith.constant dense<0.000000e+00> : vector<8x128xf32>
    %155 = tpu.matmul %150, %6, %cst_48 {dimension_numbers = #tpu.dot_dimension_numbers<[1], [0], [0], [1], [0, 0, 1, 1], [], []>} : vector<8x32xf32>, vector<32x128xf32>, vector<8x128xf32> -> vector<8x128xf32>
    %156 = arith.addf %154, %155 : vector<8x128xf32>
    %157 = arith.negf %156 : vector<8x128xf32>
    %158 = math.exp %157 : vector<8x128xf32>
    %cst_49 = arith.constant 1.000000e+00 : f32
    %159 = vector.broadcast %cst_49 : f32 to vector<8x128xf32>
    %160 = arith.addf %159, %158 : vector<8x128xf32>
    %161 = arith.divf %159, %160 : vector<8x128xf32>
    %162 = vector.extract_strided_slice %161 {offsets = [0, 0], sizes = [8, 32], strides = [1, 1]} : vector<8x128xf32> to vector<8x32xf32>
    %163 = vector.extract_strided_slice %161 {offsets = [0, 32], sizes = [8, 32], strides = [1, 1]} : vector<8x128xf32> to vector<8x32xf32>
    %164 = vector.extract_strided_slice %161 {offsets = [0, 64], sizes = [8, 32], strides = [1, 1]} : vector<8x128xf32> to vector<8x32xf32>
    %cst_50 = arith.constant 2.000000e+00 : f32
    %165 = vector.broadcast %cst_50 : f32 to vector<8x32xf32>
    %166 = arith.mulf %165, %164 : vector<8x32xf32>
    %cst_51 = arith.constant 1.000000e+00 : f32
    %167 = vector.broadcast %cst_51 : f32 to vector<8x32xf32>
    %168 = arith.subf %166, %167 : vector<8x32xf32>
    %169 = vector.extract_strided_slice %161 {offsets = [0, 96], sizes = [8, 32], strides = [1, 1]} : vector<8x128xf32> to vector<8x32xf32>
    %170 = arith.mulf %163, %148 : vector<8x32xf32>
    %171 = arith.mulf %162, %168 : vector<8x32xf32>
    %172 = arith.addf %170, %171 : vector<8x32xf32>
    %173 = math.tanh %172 : vector<8x32xf32>
    %174 = arith.mulf %169, %173 : vector<8x32xf32>
    %c6 = arith.constant 6 : index
    %c0_52 = arith.constant 0 : index
    %c0_53 = arith.constant 0 : index
    %175 = vector.load %arg13[%c6, %c0_52, %c0_53] : memref<8x8x64xf32, #tpu.memory_space<vmem>>, vector<1x8x32xf32>
    %176 = vector.shape_cast %175 : vector<1x8x32xf32> to vector<8x32xf32>
    %177 = vector.shape_cast %174 : vector<8x32xf32> to vector<1x8x32xf32>
    tpu.vector_store %arg13[%c6, %c0_52, %c0_53], %177 {strides = array<i32>} : memref<8x8x64xf32, #tpu.memory_space<vmem>>, vector<1x8x32xf32>,
    %178 = vector.extract_strided_slice %5 {offsets = [56, 0], sizes = [8, 128], strides = [1, 1]} : vector<64x256xf32> to vector<8x128xf32>
    %cst_54 = arith.constant dense<0.000000e+00> : vector<8x128xf32>
    %179 = tpu.matmul %174, %6, %cst_54 {dimension_numbers = #tpu.dot_dimension_numbers<[1], [0], [0], [1], [0, 0, 1, 1], [], []>} : vector<8x32xf32>, vector<32x128xf32>, vector<8x128xf32> -> vector<8x128xf32>
    %180 = arith.addf %178, %179 : vector<8x128xf32>
    %181 = arith.negf %180 : vector<8x128xf32>
    %182 = math.exp %181 : vector<8x128xf32>
    %cst_55 = arith.constant 1.000000e+00 : f32
    %183 = vector.broadcast %cst_55 : f32 to vector<8x128xf32>
    %184 = arith.addf %183, %182 : vector<8x128xf32>
    %185 = arith.divf %183, %184 : vector<8x128xf32>
    %186 = vector.extract_strided_slice %185 {offsets = [0, 0], sizes = [8, 32], strides = [1, 1]} : vector<8x128xf32> to vector<8x32xf32>
    %187 = vector.extract_strided_slice %185 {offsets = [0, 32], sizes = [8, 32], strides = [1, 1]} : vector<8x128xf32> to vector<8x32xf32>
    %188 = vector.extract_strided_slice %185 {offsets = [0, 64], sizes = [8, 32], strides = [1, 1]} : vector<8x128xf32> to vector<8x32xf32>
    %cst_56 = arith.constant 2.000000e+00 : f32
    %189 = vector.broadcast %cst_56 : f32 to vector<8x32xf32>
    %190 = arith.mulf %189, %188 : vector<8x32xf32>
    %cst_57 = arith.constant 1.000000e+00 : f32
    %191 = vector.broadcast %cst_57 : f32 to vector<8x32xf32>
    %192 = arith.subf %190, %191 : vector<8x32xf32>
    %193 = vector.extract_strided_slice %185 {offsets = [0, 96], sizes = [8, 32], strides = [1, 1]} : vector<8x128xf32> to vector<8x32xf32>
    %194 = arith.mulf %187, %172 : vector<8x32xf32>
    %195 = arith.mulf %186, %192 : vector<8x32xf32>
    %196 = arith.addf %194, %195 : vector<8x32xf32>
    %197 = math.tanh %196 : vector<8x32xf32>
    %198 = arith.mulf %193, %197 : vector<8x32xf32>
    %c7 = arith.constant 7 : index
    %c0_58 = arith.constant 0 : index
    %c0_59 = arith.constant 0 : index
    %199 = vector.load %arg13[%c7, %c0_58, %c0_59] : memref<8x8x64xf32, #tpu.memory_space<vmem>>, vector<1x8x32xf32>
    %200 = vector.shape_cast %199 : vector<1x8x32xf32> to vector<8x32xf32>
    %201 = vector.shape_cast %198 : vector<8x32xf32> to vector<1x8x32xf32>
    tpu.vector_store %arg13[%c7, %c0_58, %c0_59], %201 {strides = array<i32>} : memref<8x8x64xf32, #tpu.memory_space<vmem>>, vector<1x8x32xf32>,
    %cst_60 = arith.constant 0.000000e+00 : f32
    %202 = vector.broadcast %cst_60 : f32 to vector<8x32xf32>
    %cst_61 = arith.constant 0.000000e+00 : f32
    %203 = vector.broadcast %cst_61 : f32 to vector<8x32xf32>
    %204 = vector.extract_strided_slice %5 {offsets = [56, 128], sizes = [8, 128], strides = [1, 1]} : vector<64x256xf32> to vector<8x128xf32>
    %cst_62 = arith.constant dense<0.000000e+00> : vector<8x128xf32>
    %205 = tpu.matmul %202, %7, %cst_62 {dimension_numbers = #tpu.dot_dimension_numbers<[1], [0], [0], [1], [0, 0, 1, 1], [], []>} : vector<8x32xf32>, vector<32x128xf32>, vector<8x128xf32> -> vector<8x128xf32>
    %206 = arith.addf %204, %205 : vector<8x128xf32>
    %207 = arith.negf %206 : vector<8x128xf32>
    %208 = math.exp %207 : vector<8x128xf32>
    %cst_63 = arith.constant 1.000000e+00 : f32
    %209 = vector.broadcast %cst_63 : f32 to vector<8x128xf32>
    %210 = arith.addf %209, %208 : vector<8x128xf32>
    %211 = arith.divf %209, %210 : vector<8x128xf32>
    %212 = vector.extract_strided_slice %211 {offsets = [0, 0], sizes = [8, 32], strides = [1, 1]} : vector<8x128xf32> to vector<8x32xf32>
    %213 = vector.extract_strided_slice %211 {offsets = [0, 32], sizes = [8, 32], strides = [1, 1]} : vector<8x128xf32> to vector<8x32xf32>
    %214 = vector.extract_strided_slice %211 {offsets = [0, 64], sizes = [8, 32], strides = [1, 1]} : vector<8x128xf32> to vector<8x32xf32>
    %cst_64 = arith.constant 2.000000e+00 : f32
    %215 = vector.broadcast %cst_64 : f32 to vector<8x32xf32>
    %216 = arith.mulf %215, %214 : vector<8x32xf32>
    %cst_65 = arith.constant 1.000000e+00 : f32
    %217 = vector.broadcast %cst_65 : f32 to vector<8x32xf32>
    %218 = arith.subf %216, %217 : vector<8x32xf32>
    %219 = vector.extract_strided_slice %211 {offsets = [0, 96], sizes = [8, 32], strides = [1, 1]} : vector<8x128xf32> to vector<8x32xf32>
    %220 = arith.mulf %213, %203 : vector<8x32xf32>
    %221 = arith.mulf %212, %218 : vector<8x32xf32>
    %222 = arith.addf %220, %221 : vector<8x32xf32>
    %223 = math.tanh %222 : vector<8x32xf32>
    %224 = arith.mulf %219, %223 : vector<8x32xf32>
    %c7_66 = arith.constant 7 : index
    %c0_67 = arith.constant 0 : index
    %c32 = arith.constant 32 : index
    %225 = vector.load %arg13[%c7_66, %c0_67, %c32] : memref<8x8x64xf32, #tpu.memory_space<vmem>>, vector<1x8x32xf32>
    %226 = vector.shape_cast %225 : vector<1x8x32xf32> to vector<8x32xf32>
    %227 = vector.shape_cast %224 : vector<8x32xf32> to vector<1x8x32xf32>
    tpu.vector_store %arg13[%c7_66, %c0_67, %c32], %227 {strides = array<i32>} : memref<8x8x64xf32, #tpu.memory_space<vmem>>, vector<1x8x32xf32>,
    %228 = vector.extract_strided_slice %5 {offsets = [48, 128], sizes = [8, 128], strides = [1, 1]} : vector<64x256xf32> to vector<8x128xf32>
    %cst_68 = arith.constant dense<0.000000e+00> : vector<8x128xf32>
    %229 = tpu.matmul %224, %7, %cst_68 {dimension_numbers = #tpu.dot_dimension_numbers<[1], [0], [0], [1], [0, 0, 1, 1], [], []>} : vector<8x32xf32>, vector<32x128xf32>, vector<8x128xf32> -> vector<8x128xf32>
    %230 = arith.addf %228, %229 : vector<8x128xf32>
    %231 = arith.negf %230 : vector<8x128xf32>
    %232 = math.exp %231 : vector<8x128xf32>
    %cst_69 = arith.constant 1.000000e+00 : f32
    %233 = vector.broadcast %cst_69 : f32 to vector<8x128xf32>
    %234 = arith.addf %233, %232 : vector<8x128xf32>
    %235 = arith.divf %233, %234 : vector<8x128xf32>
    %236 = vector.extract_strided_slice %235 {offsets = [0, 0], sizes = [8, 32], strides = [1, 1]} : vector<8x128xf32> to vector<8x32xf32>
    %237 = vector.extract_strided_slice %235 {offsets = [0, 32], sizes = [8, 32], strides = [1, 1]} : vector<8x128xf32> to vector<8x32xf32>
    %238 = vector.extract_strided_slice %235 {offsets = [0, 64], sizes = [8, 32], strides = [1, 1]} : vector<8x128xf32> to vector<8x32xf32>
    %cst_70 = arith.constant 2.000000e+00 : f32
    %239 = vector.broadcast %cst_70 : f32 to vector<8x32xf32>
    %240 = arith.mulf %239, %238 : vector<8x32xf32>
    %cst_71 = arith.constant 1.000000e+00 : f32
    %241 = vector.broadcast %cst_71 : f32 to vector<8x32xf32>
    %242 = arith.subf %240, %241 : vector<8x32xf32>
    %243 = vector.extract_strided_slice %235 {offsets = [0, 96], sizes = [8, 32], strides = [1, 1]} : vector<8x128xf32> to vector<8x32xf32>
    %244 = arith.mulf %237, %222 : vector<8x32xf32>
    %245 = arith.mulf %236, %242 : vector<8x32xf32>
    %246 = arith.addf %244, %245 : vector<8x32xf32>
    %247 = math.tanh %246 : vector<8x32xf32>
    %248 = arith.mulf %243, %247 : vector<8x32xf32>
    %c6_72 = arith.constant 6 : index
    %c0_73 = arith.constant 0 : index
    %c32_74 = arith.constant 32 : index
    %249 = vector.load %arg13[%c6_72, %c0_73, %c32_74] : memref<8x8x64xf32, #tpu.memory_space<vmem>>, vector<1x8x32xf32>
    %250 = vector.shape_cast %249 : vector<1x8x32xf32> to vector<8x32xf32>
    %251 = vector.shape_cast %248 : vector<8x32xf32> to vector<1x8x32xf32>
    tpu.vector_store %arg13[%c6_72, %c0_73, %c32_74], %251 {strides = array<i32>} : memref<8x8x64xf32, #tpu.memory_space<vmem>>, vector<1x8x32xf32>,
    %252 = vector.extract_strided_slice %5 {offsets = [40, 128], sizes = [8, 128], strides = [1, 1]} : vector<64x256xf32> to vector<8x128xf32>
    %cst_75 = arith.constant dense<0.000000e+00> : vector<8x128xf32>
    %253 = tpu.matmul %248, %7, %cst_75 {dimension_numbers = #tpu.dot_dimension_numbers<[1], [0], [0], [1], [0, 0, 1, 1], [], []>} : vector<8x32xf32>, vector<32x128xf32>, vector<8x128xf32> -> vector<8x128xf32>
    %254 = arith.addf %252, %253 : vector<8x128xf32>
    %255 = arith.negf %254 : vector<8x128xf32>
    %256 = math.exp %255 : vector<8x128xf32>
    %cst_76 = arith.constant 1.000000e+00 : f32
    %257 = vector.broadcast %cst_76 : f32 to vector<8x128xf32>
    %258 = arith.addf %257, %256 : vector<8x128xf32>
    %259 = arith.divf %257, %258 : vector<8x128xf32>
    %260 = vector.extract_strided_slice %259 {offsets = [0, 0], sizes = [8, 32], strides = [1, 1]} : vector<8x128xf32> to vector<8x32xf32>
    %261 = vector.extract_strided_slice %259 {offsets = [0, 32], sizes = [8, 32], strides = [1, 1]} : vector<8x128xf32> to vector<8x32xf32>
    %262 = vector.extract_strided_slice %259 {offsets = [0, 64], sizes = [8, 32], strides = [1, 1]} : vector<8x128xf32> to vector<8x32xf32>
    %cst_77 = arith.constant 2.000000e+00 : f32
    %263 = vector.broadcast %cst_77 : f32 to vector<8x32xf32>
    %264 = arith.mulf %263, %262 : vector<8x32xf32>
    %cst_78 = arith.constant 1.000000e+00 : f32
    %265 = vector.broadcast %cst_78 : f32 to vector<8x32xf32>
    %266 = arith.subf %264, %265 : vector<8x32xf32>
    %267 = vector.extract_strided_slice %259 {offsets = [0, 96], sizes = [8, 32], strides = [1, 1]} : vector<8x128xf32> to vector<8x32xf32>
    %268 = arith.mulf %261, %246 : vector<8x32xf32>
    %269 = arith.mulf %260, %266 : vector<8x32xf32>
    %270 = arith.addf %268, %269 : vector<8x32xf32>
    %271 = math.tanh %270 : vector<8x32xf32>
    %272 = arith.mulf %267, %271 : vector<8x32xf32>
    %c5_79 = arith.constant 5 : index
    %c0_80 = arith.constant 0 : index
    %c32_81 = arith.constant 32 : index
    %273 = vector.load %arg13[%c5_79, %c0_80, %c32_81] : memref<8x8x64xf32, #tpu.memory_space<vmem>>, vector<1x8x32xf32>
    %274 = vector.shape_cast %273 : vector<1x8x32xf32> to vector<8x32xf32>
    %275 = vector.shape_cast %272 : vector<8x32xf32> to vector<1x8x32xf32>
    tpu.vector_store %arg13[%c5_79, %c0_80, %c32_81], %275 {strides = array<i32>} : memref<8x8x64xf32, #tpu.memory_space<vmem>>, vector<1x8x32xf32>,
    %276 = vector.extract_strided_slice %5 {offsets = [32, 128], sizes = [8, 128], strides = [1, 1]} : vector<64x256xf32> to vector<8x128xf32>
    %cst_82 = arith.constant dense<0.000000e+00> : vector<8x128xf32>
    %277 = tpu.matmul %272, %7, %cst_82 {dimension_numbers = #tpu.dot_dimension_numbers<[1], [0], [0], [1], [0, 0, 1, 1], [], []>} : vector<8x32xf32>, vector<32x128xf32>, vector<8x128xf32> -> vector<8x128xf32>
    %278 = arith.addf %276, %277 : vector<8x128xf32>
    %279 = arith.negf %278 : vector<8x128xf32>
    %280 = math.exp %279 : vector<8x128xf32>
    %cst_83 = arith.constant 1.000000e+00 : f32
    %281 = vector.broadcast %cst_83 : f32 to vector<8x128xf32>
    %282 = arith.addf %281, %280 : vector<8x128xf32>
    %283 = arith.divf %281, %282 : vector<8x128xf32>
    %284 = vector.extract_strided_slice %283 {offsets = [0, 0], sizes = [8, 32], strides = [1, 1]} : vector<8x128xf32> to vector<8x32xf32>
    %285 = vector.extract_strided_slice %283 {offsets = [0, 32], sizes = [8, 32], strides = [1, 1]} : vector<8x128xf32> to vector<8x32xf32>
    %286 = vector.extract_strided_slice %283 {offsets = [0, 64], sizes = [8, 32], strides = [1, 1]} : vector<8x128xf32> to vector<8x32xf32>
    %cst_84 = arith.constant 2.000000e+00 : f32
    %287 = vector.broadcast %cst_84 : f32 to vector<8x32xf32>
    %288 = arith.mulf %287, %286 : vector<8x32xf32>
    %cst_85 = arith.constant 1.000000e+00 : f32
    %289 = vector.broadcast %cst_85 : f32 to vector<8x32xf32>
    %290 = arith.subf %288, %289 : vector<8x32xf32>
    %291 = vector.extract_strided_slice %283 {offsets = [0, 96], sizes = [8, 32], strides = [1, 1]} : vector<8x128xf32> to vector<8x32xf32>
    %292 = arith.mulf %285, %270 : vector<8x32xf32>
    %293 = arith.mulf %284, %290 : vector<8x32xf32>
    %294 = arith.addf %292, %293 : vector<8x32xf32>
    %295 = math.tanh %294 : vector<8x32xf32>
    %296 = arith.mulf %291, %295 : vector<8x32xf32>
    %c4_86 = arith.constant 4 : index
    %c0_87 = arith.constant 0 : index
    %c32_88 = arith.constant 32 : index
    %297 = vector.load %arg13[%c4_86, %c0_87, %c32_88] : memref<8x8x64xf32, #tpu.memory_space<vmem>>, vector<1x8x32xf32>
    %298 = vector.shape_cast %297 : vector<1x8x32xf32> to vector<8x32xf32>
    %299 = vector.shape_cast %296 : vector<8x32xf32> to vector<1x8x32xf32>
    tpu.vector_store %arg13[%c4_86, %c0_87, %c32_88], %299 {strides = array<i32>} : memref<8x8x64xf32, #tpu.memory_space<vmem>>, vector<1x8x32xf32>,
    %300 = vector.extract_strided_slice %5 {offsets = [24, 128], sizes = [8, 128], strides = [1, 1]} : vector<64x256xf32> to vector<8x128xf32>
    %cst_89 = arith.constant dense<0.000000e+00> : vector<8x128xf32>
    %301 = tpu.matmul %296, %7, %cst_89 {dimension_numbers = #tpu.dot_dimension_numbers<[1], [0], [0], [1], [0, 0, 1, 1], [], []>} : vector<8x32xf32>, vector<32x128xf32>, vector<8x128xf32> -> vector<8x128xf32>
    %302 = arith.addf %300, %301 : vector<8x128xf32>
    %303 = arith.negf %302 : vector<8x128xf32>
    %304 = math.exp %303 : vector<8x128xf32>
    %cst_90 = arith.constant 1.000000e+00 : f32
    %305 = vector.broadcast %cst_90 : f32 to vector<8x128xf32>
    %306 = arith.addf %305, %304 : vector<8x128xf32>
    %307 = arith.divf %305, %306 : vector<8x128xf32>
    %308 = vector.extract_strided_slice %307 {offsets = [0, 0], sizes = [8, 32], strides = [1, 1]} : vector<8x128xf32> to vector<8x32xf32>
    %309 = vector.extract_strided_slice %307 {offsets = [0, 32], sizes = [8, 32], strides = [1, 1]} : vector<8x128xf32> to vector<8x32xf32>
    %310 = vector.extract_strided_slice %307 {offsets = [0, 64], sizes = [8, 32], strides = [1, 1]} : vector<8x128xf32> to vector<8x32xf32>
    %cst_91 = arith.constant 2.000000e+00 : f32
    %311 = vector.broadcast %cst_91 : f32 to vector<8x32xf32>
    %312 = arith.mulf %311, %310 : vector<8x32xf32>
    %cst_92 = arith.constant 1.000000e+00 : f32
    %313 = vector.broadcast %cst_92 : f32 to vector<8x32xf32>
    %314 = arith.subf %312, %313 : vector<8x32xf32>
    %315 = vector.extract_strided_slice %307 {offsets = [0, 96], sizes = [8, 32], strides = [1, 1]} : vector<8x128xf32> to vector<8x32xf32>
    %316 = arith.mulf %309, %294 : vector<8x32xf32>
    %317 = arith.mulf %308, %314 : vector<8x32xf32>
    %318 = arith.addf %316, %317 : vector<8x32xf32>
    %319 = math.tanh %318 : vector<8x32xf32>
    %320 = arith.mulf %315, %319 : vector<8x32xf32>
    %c3_93 = arith.constant 3 : index
    %c0_94 = arith.constant 0 : index
    %c32_95 = arith.constant 32 : index
    %321 = vector.load %arg13[%c3_93, %c0_94, %c32_95] : memref<8x8x64xf32, #tpu.memory_space<vmem>>, vector<1x8x32xf32>
    %322 = vector.shape_cast %321 : vector<1x8x32xf32> to vector<8x32xf32>
    %323 = vector.shape_cast %320 : vector<8x32xf32> to vector<1x8x32xf32>
    tpu.vector_store %arg13[%c3_93, %c0_94, %c32_95], %323 {strides = array<i32>} : memref<8x8x64xf32, #tpu.memory_space<vmem>>, vector<1x8x32xf32>,
    %324 = vector.extract_strided_slice %5 {offsets = [16, 128], sizes = [8, 128], strides = [1, 1]} : vector<64x256xf32> to vector<8x128xf32>
    %cst_96 = arith.constant dense<0.000000e+00> : vector<8x128xf32>
    %325 = tpu.matmul %320, %7, %cst_96 {dimension_numbers = #tpu.dot_dimension_numbers<[1], [0], [0], [1], [0, 0, 1, 1], [], []>} : vector<8x32xf32>, vector<32x128xf32>, vector<8x128xf32> -> vector<8x128xf32>
    %326 = arith.addf %324, %325 : vector<8x128xf32>
    %327 = arith.negf %326 : vector<8x128xf32>
    %328 = math.exp %327 : vector<8x128xf32>
    %cst_97 = arith.constant 1.000000e+00 : f32
    %329 = vector.broadcast %cst_97 : f32 to vector<8x128xf32>
    %330 = arith.addf %329, %328 : vector<8x128xf32>
    %331 = arith.divf %329, %330 : vector<8x128xf32>
    %332 = vector.extract_strided_slice %331 {offsets = [0, 0], sizes = [8, 32], strides = [1, 1]} : vector<8x128xf32> to vector<8x32xf32>
    %333 = vector.extract_strided_slice %331 {offsets = [0, 32], sizes = [8, 32], strides = [1, 1]} : vector<8x128xf32> to vector<8x32xf32>
    %334 = vector.extract_strided_slice %331 {offsets = [0, 64], sizes = [8, 32], strides = [1, 1]} : vector<8x128xf32> to vector<8x32xf32>
    %cst_98 = arith.constant 2.000000e+00 : f32
    %335 = vector.broadcast %cst_98 : f32 to vector<8x32xf32>
    %336 = arith.mulf %335, %334 : vector<8x32xf32>
    %cst_99 = arith.constant 1.000000e+00 : f32
    %337 = vector.broadcast %cst_99 : f32 to vector<8x32xf32>
    %338 = arith.subf %336, %337 : vector<8x32xf32>
    %339 = vector.extract_strided_slice %331 {offsets = [0, 96], sizes = [8, 32], strides = [1, 1]} : vector<8x128xf32> to vector<8x32xf32>
    %340 = arith.mulf %333, %318 : vector<8x32xf32>
    %341 = arith.mulf %332, %338 : vector<8x32xf32>
    %342 = arith.addf %340, %341 : vector<8x32xf32>
    %343 = math.tanh %342 : vector<8x32xf32>
    %344 = arith.mulf %339, %343 : vector<8x32xf32>
    %c2_100 = arith.constant 2 : index
    %c0_101 = arith.constant 0 : index
    %c32_102 = arith.constant 32 : index
    %345 = vector.load %arg13[%c2_100, %c0_101, %c32_102] : memref<8x8x64xf32, #tpu.memory_space<vmem>>, vector<1x8x32xf32>
    %346 = vector.shape_cast %345 : vector<1x8x32xf32> to vector<8x32xf32>
    %347 = vector.shape_cast %344 : vector<8x32xf32> to vector<1x8x32xf32>
    tpu.vector_store %arg13[%c2_100, %c0_101, %c32_102], %347 {strides = array<i32>} : memref<8x8x64xf32, #tpu.memory_space<vmem>>, vector<1x8x32xf32>,
    %348 = vector.extract_strided_slice %5 {offsets = [8, 128], sizes = [8, 128], strides = [1, 1]} : vector<64x256xf32> to vector<8x128xf32>
    %cst_103 = arith.constant dense<0.000000e+00> : vector<8x128xf32>
    %349 = tpu.matmul %344, %7, %cst_103 {dimension_numbers = #tpu.dot_dimension_numbers<[1], [0], [0], [1], [0, 0, 1, 1], [], []>} : vector<8x32xf32>, vector<32x128xf32>, vector<8x128xf32> -> vector<8x128xf32>
    %350 = arith.addf %348, %349 : vector<8x128xf32>
    %351 = arith.negf %350 : vector<8x128xf32>
    %352 = math.exp %351 : vector<8x128xf32>
    %cst_104 = arith.constant 1.000000e+00 : f32
    %353 = vector.broadcast %cst_104 : f32 to vector<8x128xf32>
    %354 = arith.addf %353, %352 : vector<8x128xf32>
    %355 = arith.divf %353, %354 : vector<8x128xf32>
    %356 = vector.extract_strided_slice %355 {offsets = [0, 0], sizes = [8, 32], strides = [1, 1]} : vector<8x128xf32> to vector<8x32xf32>
    %357 = vector.extract_strided_slice %355 {offsets = [0, 32], sizes = [8, 32], strides = [1, 1]} : vector<8x128xf32> to vector<8x32xf32>
    %358 = vector.extract_strided_slice %355 {offsets = [0, 64], sizes = [8, 32], strides = [1, 1]} : vector<8x128xf32> to vector<8x32xf32>
    %cst_105 = arith.constant 2.000000e+00 : f32
    %359 = vector.broadcast %cst_105 : f32 to vector<8x32xf32>
    %360 = arith.mulf %359, %358 : vector<8x32xf32>
    %cst_106 = arith.constant 1.000000e+00 : f32
    %361 = vector.broadcast %cst_106 : f32 to vector<8x32xf32>
    %362 = arith.subf %360, %361 : vector<8x32xf32>
    %363 = vector.extract_strided_slice %355 {offsets = [0, 96], sizes = [8, 32], strides = [1, 1]} : vector<8x128xf32> to vector<8x32xf32>
    %364 = arith.mulf %357, %342 : vector<8x32xf32>
    %365 = arith.mulf %356, %362 : vector<8x32xf32>
    %366 = arith.addf %364, %365 : vector<8x32xf32>
    %367 = math.tanh %366 : vector<8x32xf32>
    %368 = arith.mulf %363, %367 : vector<8x32xf32>
    %c1_107 = arith.constant 1 : index
    %c0_108 = arith.constant 0 : index
    %c32_109 = arith.constant 32 : index
    %369 = vector.load %arg13[%c1_107, %c0_108, %c32_109] : memref<8x8x64xf32, #tpu.memory_space<vmem>>, vector<1x8x32xf32>
    %370 = vector.shape_cast %369 : vector<1x8x32xf32> to vector<8x32xf32>
    %371 = vector.shape_cast %368 : vector<8x32xf32> to vector<1x8x32xf32>
    tpu.vector_store %arg13[%c1_107, %c0_108, %c32_109], %371 {strides = array<i32>} : memref<8x8x64xf32, #tpu.memory_space<vmem>>, vector<1x8x32xf32>,
    %372 = vector.extract_strided_slice %5 {offsets = [0, 128], sizes = [8, 128], strides = [1, 1]} : vector<64x256xf32> to vector<8x128xf32>
    %cst_110 = arith.constant dense<0.000000e+00> : vector<8x128xf32>
    %373 = tpu.matmul %368, %7, %cst_110 {dimension_numbers = #tpu.dot_dimension_numbers<[1], [0], [0], [1], [0, 0, 1, 1], [], []>} : vector<8x32xf32>, vector<32x128xf32>, vector<8x128xf32> -> vector<8x128xf32>
    %374 = arith.addf %372, %373 : vector<8x128xf32>
    %375 = arith.negf %374 : vector<8x128xf32>
    %376 = math.exp %375 : vector<8x128xf32>
    %cst_111 = arith.constant 1.000000e+00 : f32
    %377 = vector.broadcast %cst_111 : f32 to vector<8x128xf32>
    %378 = arith.addf %377, %376 : vector<8x128xf32>
    %379 = arith.divf %377, %378 : vector<8x128xf32>
    %380 = vector.extract_strided_slice %379 {offsets = [0, 0], sizes = [8, 32], strides = [1, 1]} : vector<8x128xf32> to vector<8x32xf32>
    %381 = vector.extract_strided_slice %379 {offsets = [0, 32], sizes = [8, 32], strides = [1, 1]} : vector<8x128xf32> to vector<8x32xf32>
    %382 = vector.extract_strided_slice %379 {offsets = [0, 64], sizes = [8, 32], strides = [1, 1]} : vector<8x128xf32> to vector<8x32xf32>
    %cst_112 = arith.constant 2.000000e+00 : f32
    %383 = vector.broadcast %cst_112 : f32 to vector<8x32xf32>
    %384 = arith.mulf %383, %382 : vector<8x32xf32>
    %cst_113 = arith.constant 1.000000e+00 : f32
    %385 = vector.broadcast %cst_113 : f32 to vector<8x32xf32>
    %386 = arith.subf %384, %385 : vector<8x32xf32>
    %387 = vector.extract_strided_slice %379 {offsets = [0, 96], sizes = [8, 32], strides = [1, 1]} : vector<8x128xf32> to vector<8x32xf32>
    %388 = arith.mulf %381, %366 : vector<8x32xf32>
    %389 = arith.mulf %380, %386 : vector<8x32xf32>
    %390 = arith.addf %388, %389 : vector<8x32xf32>
    %391 = math.tanh %390 : vector<8x32xf32>
    %392 = arith.mulf %387, %391 : vector<8x32xf32>
    %c0_114 = arith.constant 0 : index
    %c0_115 = arith.constant 0 : index
    %c32_116 = arith.constant 32 : index
    %393 = vector.load %arg13[%c0_114, %c0_115, %c32_116] : memref<8x8x64xf32, #tpu.memory_space<vmem>>, vector<1x8x32xf32>
    %394 = vector.shape_cast %393 : vector<1x8x32xf32> to vector<8x32xf32>
    %395 = vector.shape_cast %392 : vector<8x32xf32> to vector<1x8x32xf32>
    tpu.vector_store %arg13[%c0_114, %c0_115, %c32_116], %395 {strides = array<i32>} : memref<8x8x64xf32, #tpu.memory_space<vmem>>, vector<1x8x32xf32>,
    %c0_117 = arith.constant 0 : index
    %c0_118 = arith.constant 0 : index
    %396 = memref.load %arg1[%c0_117, %c0_118] : memref<8x3xi32, #tpu.memory_space<smem>>
    %c0_119 = arith.constant 0 : index
    %c2_120 = arith.constant 2 : index
    %397 = memref.load %arg1[%c0_119, %c2_120] : memref<8x3xi32, #tpu.memory_space<smem>>
    %398 = arith.index_cast %396 : i32 to index
    %c0_121 = arith.constant 0 : index
    %c0_122 = arith.constant 0 : index
    %399 = vector.load %arg13[%398, %c0_121, %c0_122] : memref<8x8x64xf32, #tpu.memory_space<vmem>>, vector<1x8x64xf32>
    %400 = vector.shape_cast %399 : vector<1x8x64xf32> to vector<8x64xf32>
    %401 = arith.index_cast %397 : i32 to index
    %c0_123 = arith.constant 0 : index
    %c0_124 = arith.constant 0 : index
    %402 = vector.load %arg13[%401, %c0_123, %c0_124] : memref<8x8x64xf32, #tpu.memory_space<vmem>>, vector<1x8x64xf32>
    %403 = vector.shape_cast %402 : vector<1x8x64xf32> to vector<8x64xf32>
    %404 = vector.extract_strided_slice %400 {offsets = [0, 0], sizes = [1, 64], strides = [1, 1]} : vector<8x64xf32> to vector<1x64xf32>
    %405 = vector.extract_strided_slice %403 {offsets = [0, 0], sizes = [1, 64], strides = [1, 1]} : vector<8x64xf32> to vector<1x64xf32>
    %406 = arith.mulf %404, %405 : vector<1x64xf32>
    %c0_125 = arith.constant 0 : index
    %c0_126 = arith.constant 0 : index
    %407 = vector.load %arg14[%c0_125, %c0_126] : memref<8x64xf32, #tpu.memory_space<vmem>>, vector<1x64xf32>
    tpu.vector_store %arg14[%c0_125, %c0_126], %406 {strides = array<i32>} : memref<8x64xf32, #tpu.memory_space<vmem>>, vector<1x64xf32>,
    %c1_127 = arith.constant 1 : index
    %c0_128 = arith.constant 0 : index
    %408 = memref.load %arg1[%c1_127, %c0_128] : memref<8x3xi32, #tpu.memory_space<smem>>
    %c1_129 = arith.constant 1 : index
    %c2_130 = arith.constant 2 : index
    %409 = memref.load %arg1[%c1_129, %c2_130] : memref<8x3xi32, #tpu.memory_space<smem>>
    %410 = arith.index_cast %408 : i32 to index
    %c0_131 = arith.constant 0 : index
    %c0_132 = arith.constant 0 : index
    %411 = vector.load %arg13[%410, %c0_131, %c0_132] : memref<8x8x64xf32, #tpu.memory_space<vmem>>, vector<1x8x64xf32>
    %412 = vector.shape_cast %411 : vector<1x8x64xf32> to vector<8x64xf32>
    %413 = arith.index_cast %409 : i32 to index
    %c0_133 = arith.constant 0 : index
    %c0_134 = arith.constant 0 : index
    %414 = vector.load %arg13[%413, %c0_133, %c0_134] : memref<8x8x64xf32, #tpu.memory_space<vmem>>, vector<1x8x64xf32>
    %415 = vector.shape_cast %414 : vector<1x8x64xf32> to vector<8x64xf32>
    %416 = vector.extract_strided_slice %412 {offsets = [1, 0], sizes = [1, 64], strides = [1, 1]} : vector<8x64xf32> to vector<1x64xf32>
    %417 = vector.extract_strided_slice %415 {offsets = [1, 0], sizes = [1, 64], strides = [1, 1]} : vector<8x64xf32> to vector<1x64xf32>
    %418 = arith.mulf %416, %417 : vector<1x64xf32>
    %c1_135 = arith.constant 1 : index
    %c0_136 = arith.constant 0 : index
    %419 = vector.load %arg14[%c1_135, %c0_136] : memref<8x64xf32, #tpu.memory_space<vmem>>, vector<1x64xf32>
    tpu.vector_store %arg14[%c1_135, %c0_136], %418 {strides = array<i32>} : memref<8x64xf32, #tpu.memory_space<vmem>>, vector<1x64xf32>,
    %c2_137 = arith.constant 2 : index
    %c0_138 = arith.constant 0 : index
    %420 = memref.load %arg1[%c2_137, %c0_138] : memref<8x3xi32, #tpu.memory_space<smem>>
    %c2_139 = arith.constant 2 : index
    %c2_140 = arith.constant 2 : index
    %421 = memref.load %arg1[%c2_139, %c2_140] : memref<8x3xi32, #tpu.memory_space<smem>>
    %422 = arith.index_cast %420 : i32 to index
    %c0_141 = arith.constant 0 : index
    %c0_142 = arith.constant 0 : index
    %423 = vector.load %arg13[%422, %c0_141, %c0_142] : memref<8x8x64xf32, #tpu.memory_space<vmem>>, vector<1x8x64xf32>
    %424 = vector.shape_cast %423 : vector<1x8x64xf32> to vector<8x64xf32>
    %425 = arith.index_cast %421 : i32 to index
    %c0_143 = arith.constant 0 : index
    %c0_144 = arith.constant 0 : index
    %426 = vector.load %arg13[%425, %c0_143, %c0_144] : memref<8x8x64xf32, #tpu.memory_space<vmem>>, vector<1x8x64xf32>
    %427 = vector.shape_cast %426 : vector<1x8x64xf32> to vector<8x64xf32>
    %428 = vector.extract_strided_slice %424 {offsets = [2, 0], sizes = [1, 64], strides = [1, 1]} : vector<8x64xf32> to vector<1x64xf32>
    %429 = vector.extract_strided_slice %427 {offsets = [2, 0], sizes = [1, 64], strides = [1, 1]} : vector<8x64xf32> to vector<1x64xf32>
    %430 = arith.mulf %428, %429 : vector<1x64xf32>
    %c2_145 = arith.constant 2 : index
    %c0_146 = arith.constant 0 : index
    %431 = vector.load %arg14[%c2_145, %c0_146] : memref<8x64xf32, #tpu.memory_space<vmem>>, vector<1x64xf32>
    tpu.vector_store %arg14[%c2_145, %c0_146], %430 {strides = array<i32>} : memref<8x64xf32, #tpu.memory_space<vmem>>, vector<1x64xf32>,
    %c3_147 = arith.constant 3 : index
    %c0_148 = arith.constant 0 : index
    %432 = memref.load %arg1[%c3_147, %c0_148] : memref<8x3xi32, #tpu.memory_space<smem>>
    %c3_149 = arith.constant 3 : index
    %c2_150 = arith.constant 2 : index
    %433 = memref.load %arg1[%c3_149, %c2_150] : memref<8x3xi32, #tpu.memory_space<smem>>
    %434 = arith.index_cast %432 : i32 to index
    %c0_151 = arith.constant 0 : index
    %c0_152 = arith.constant 0 : index
    %435 = vector.load %arg13[%434, %c0_151, %c0_152] : memref<8x8x64xf32, #tpu.memory_space<vmem>>, vector<1x8x64xf32>
    %436 = vector.shape_cast %435 : vector<1x8x64xf32> to vector<8x64xf32>
    %437 = arith.index_cast %433 : i32 to index
    %c0_153 = arith.constant 0 : index
    %c0_154 = arith.constant 0 : index
    %438 = vector.load %arg13[%437, %c0_153, %c0_154] : memref<8x8x64xf32, #tpu.memory_space<vmem>>, vector<1x8x64xf32>
    %439 = vector.shape_cast %438 : vector<1x8x64xf32> to vector<8x64xf32>
    %440 = vector.extract_strided_slice %436 {offsets = [3, 0], sizes = [1, 64], strides = [1, 1]} : vector<8x64xf32> to vector<1x64xf32>
    %441 = vector.extract_strided_slice %439 {offsets = [3, 0], sizes = [1, 64], strides = [1, 1]} : vector<8x64xf32> to vector<1x64xf32>
    %442 = arith.mulf %440, %441 : vector<1x64xf32>
    %c3_155 = arith.constant 3 : index
    %c0_156 = arith.constant 0 : index
    %443 = vector.load %arg14[%c3_155, %c0_156] : memref<8x64xf32, #tpu.memory_space<vmem>>, vector<1x64xf32>
    tpu.vector_store %arg14[%c3_155, %c0_156], %442 {strides = array<i32>} : memref<8x64xf32, #tpu.memory_space<vmem>>, vector<1x64xf32>,
    %c4_157 = arith.constant 4 : index
    %c0_158 = arith.constant 0 : index
    %444 = memref.load %arg1[%c4_157, %c0_158] : memref<8x3xi32, #tpu.memory_space<smem>>
    %c4_159 = arith.constant 4 : index
    %c2_160 = arith.constant 2 : index
    %445 = memref.load %arg1[%c4_159, %c2_160] : memref<8x3xi32, #tpu.memory_space<smem>>
    %446 = arith.index_cast %444 : i32 to index
    %c0_161 = arith.constant 0 : index
    %c0_162 = arith.constant 0 : index
    %447 = vector.load %arg13[%446, %c0_161, %c0_162] : memref<8x8x64xf32, #tpu.memory_space<vmem>>, vector<1x8x64xf32>
    %448 = vector.shape_cast %447 : vector<1x8x64xf32> to vector<8x64xf32>
    %449 = arith.index_cast %445 : i32 to index
    %c0_163 = arith.constant 0 : index
    %c0_164 = arith.constant 0 : index
    %450 = vector.load %arg13[%449, %c0_163, %c0_164] : memref<8x8x64xf32, #tpu.memory_space<vmem>>, vector<1x8x64xf32>
    %451 = vector.shape_cast %450 : vector<1x8x64xf32> to vector<8x64xf32>
    %452 = vector.extract_strided_slice %448 {offsets = [4, 0], sizes = [1, 64], strides = [1, 1]} : vector<8x64xf32> to vector<1x64xf32>
    %453 = vector.extract_strided_slice %451 {offsets = [4, 0], sizes = [1, 64], strides = [1, 1]} : vector<8x64xf32> to vector<1x64xf32>
    %454 = arith.mulf %452, %453 : vector<1x64xf32>
    %c4_165 = arith.constant 4 : index
    %c0_166 = arith.constant 0 : index
    %455 = vector.load %arg14[%c4_165, %c0_166] : memref<8x64xf32, #tpu.memory_space<vmem>>, vector<1x64xf32>
    tpu.vector_store %arg14[%c4_165, %c0_166], %454 {strides = array<i32>} : memref<8x64xf32, #tpu.memory_space<vmem>>, vector<1x64xf32>,
    %c5_167 = arith.constant 5 : index
    %c0_168 = arith.constant 0 : index
    %456 = memref.load %arg1[%c5_167, %c0_168] : memref<8x3xi32, #tpu.memory_space<smem>>
    %c5_169 = arith.constant 5 : index
    %c2_170 = arith.constant 2 : index
    %457 = memref.load %arg1[%c5_169, %c2_170] : memref<8x3xi32, #tpu.memory_space<smem>>
    %458 = arith.index_cast %456 : i32 to index
    %c0_171 = arith.constant 0 : index
    %c0_172 = arith.constant 0 : index
    %459 = vector.load %arg13[%458, %c0_171, %c0_172] : memref<8x8x64xf32, #tpu.memory_space<vmem>>, vector<1x8x64xf32>
    %460 = vector.shape_cast %459 : vector<1x8x64xf32> to vector<8x64xf32>
    %461 = arith.index_cast %457 : i32 to index
    %c0_173 = arith.constant 0 : index
    %c0_174 = arith.constant 0 : index
    %462 = vector.load %arg13[%461, %c0_173, %c0_174] : memref<8x8x64xf32, #tpu.memory_space<vmem>>, vector<1x8x64xf32>
    %463 = vector.shape_cast %462 : vector<1x8x64xf32> to vector<8x64xf32>
    %464 = vector.extract_strided_slice %460 {offsets = [5, 0], sizes = [1, 64], strides = [1, 1]} : vector<8x64xf32> to vector<1x64xf32>
    %465 = vector.extract_strided_slice %463 {offsets = [5, 0], sizes = [1, 64], strides = [1, 1]} : vector<8x64xf32> to vector<1x64xf32>
    %466 = arith.mulf %464, %465 : vector<1x64xf32>
    %c5_175 = arith.constant 5 : index
    %c0_176 = arith.constant 0 : index
    %467 = vector.load %arg14[%c5_175, %c0_176] : memref<8x64xf32, #tpu.memory_space<vmem>>, vector<1x64xf32>
    tpu.vector_store %arg14[%c5_175, %c0_176], %466 {strides = array<i32>} : memref<8x64xf32, #tpu.memory_space<vmem>>, vector<1x64xf32>,
    %c6_177 = arith.constant 6 : index
    %c0_178 = arith.constant 0 : index
    %468 = memref.load %arg1[%c6_177, %c0_178] : memref<8x3xi32, #tpu.memory_space<smem>>
    %c6_179 = arith.constant 6 : index
    %c2_180 = arith.constant 2 : index
    %469 = memref.load %arg1[%c6_179, %c2_180] : memref<8x3xi32, #tpu.memory_space<smem>>
    %470 = arith.index_cast %468 : i32 to index
    %c0_181 = arith.constant 0 : index
    %c0_182 = arith.constant 0 : index
    %471 = vector.load %arg13[%470, %c0_181, %c0_182] : memref<8x8x64xf32, #tpu.memory_space<vmem>>, vector<1x8x64xf32>
    %472 = vector.shape_cast %471 : vector<1x8x64xf32> to vector<8x64xf32>
    %473 = arith.index_cast %469 : i32 to index
    %c0_183 = arith.constant 0 : index
    %c0_184 = arith.constant 0 : index
    %474 = vector.load %arg13[%473, %c0_183, %c0_184] : memref<8x8x64xf32, #tpu.memory_space<vmem>>, vector<1x8x64xf32>
    %475 = vector.shape_cast %474 : vector<1x8x64xf32> to vector<8x64xf32>
    %476 = vector.extract_strided_slice %472 {offsets = [6, 0], sizes = [1, 64], strides = [1, 1]} : vector<8x64xf32> to vector<1x64xf32>
    %477 = vector.extract_strided_slice %475 {offsets = [6, 0], sizes = [1, 64], strides = [1, 1]} : vector<8x64xf32> to vector<1x64xf32>
    %478 = arith.mulf %476, %477 : vector<1x64xf32>
    %c6_185 = arith.constant 6 : index
    %c0_186 = arith.constant 0 : index
    %479 = vector.load %arg14[%c6_185, %c0_186] : memref<8x64xf32, #tpu.memory_space<vmem>>, vector<1x64xf32>
    tpu.vector_store %arg14[%c6_185, %c0_186], %478 {strides = array<i32>} : memref<8x64xf32, #tpu.memory_space<vmem>>, vector<1x64xf32>,
    %c7_187 = arith.constant 7 : index
    %c0_188 = arith.constant 0 : index
    %480 = memref.load %arg1[%c7_187, %c0_188] : memref<8x3xi32, #tpu.memory_space<smem>>
    %c7_189 = arith.constant 7 : index
    %c2_190 = arith.constant 2 : index
    %481 = memref.load %arg1[%c7_189, %c2_190] : memref<8x3xi32, #tpu.memory_space<smem>>
    %482 = arith.index_cast %480 : i32 to index
    %c0_191 = arith.constant 0 : index
    %c0_192 = arith.constant 0 : index
    %483 = vector.load %arg13[%482, %c0_191, %c0_192] : memref<8x8x64xf32, #tpu.memory_space<vmem>>, vector<1x8x64xf32>
    %484 = vector.shape_cast %483 : vector<1x8x64xf32> to vector<8x64xf32>
    %485 = arith.index_cast %481 : i32 to index
    %c0_193 = arith.constant 0 : index
    %c0_194 = arith.constant 0 : index
    %486 = vector.load %arg13[%485, %c0_193, %c0_194] : memref<8x8x64xf32, #tpu.memory_space<vmem>>, vector<1x8x64xf32>
    %487 = vector.shape_cast %486 : vector<1x8x64xf32> to vector<8x64xf32>
    %488 = vector.extract_strided_slice %484 {offsets = [7, 0], sizes = [1, 64], strides = [1, 1]} : vector<8x64xf32> to vector<1x64xf32>
    %489 = vector.extract_strided_slice %487 {offsets = [7, 0], sizes = [1, 64], strides = [1, 1]} : vector<8x64xf32> to vector<1x64xf32>
    %490 = arith.mulf %488, %489 : vector<1x64xf32>
    %c7_195 = arith.constant 7 : index
    %c0_196 = arith.constant 0 : index
    %491 = vector.load %arg14[%c7_195, %c0_196] : memref<8x64xf32, #tpu.memory_space<vmem>>, vector<1x64xf32>
    tpu.vector_store %arg14[%c7_195, %c0_196], %490 {strides = array<i32>} : memref<8x64xf32, #tpu.memory_space<vmem>>, vector<1x64xf32>,
    %c0_197 = arith.constant 0 : index
    %c0_198 = arith.constant 0 : index
    %492 = vector.load %arg14[%c0_197, %c0_198] : memref<8x64xf32, #tpu.memory_space<vmem>>, vector<8x64xf32>
    %c0_199 = arith.constant 0 : index
    %c0_200 = arith.constant 0 : index
    %493 = vector.load %arg7[%c0_199, %c0_200] : memref<64x64xf32, #tpu.memory_space<vmem>>, vector<64x64xf32>
    %cst_201 = arith.constant dense<0.000000e+00> : vector<8x64xf32>
    %494 = tpu.matmul %492, %493, %cst_201 {dimension_numbers = #tpu.dot_dimension_numbers<[1], [0], [0], [1], [0, 0, 1, 1], [], []>} : vector<8x64xf32>, vector<64x64xf32>, vector<8x64xf32> -> vector<8x64xf32>
    %c0_202 = arith.constant 0 : index
    %c0_203 = arith.constant 0 : index
    %495 = vector.load %arg8[%c0_202, %c0_203] : memref<1x64xf32, #tpu.memory_space<vmem>>, vector<1x64xf32>
    %496 = vector.broadcast %495 : vector<1x64xf32> to vector<8x64xf32>
    %497 = arith.addf %494, %496 : vector<8x64xf32>
    %cst_204 = arith.constant 0.000000e+00 : f32
    %498 = vector.broadcast %cst_204 : f32 to vector<8x64xf32>
    %499 = arith.cmpf ogt, %497, %498 : vector<8x64xf32>
    %cst_205 = arith.constant 0.00999999977 : f32
    %500 = vector.broadcast %cst_205 : f32 to vector<8x64xf32>
    %501 = arith.mulf %500, %497 : vector<8x64xf32>
    %502 = arith.select %499, %497, %501 : vector<8x64xi1>, vector<8x64xf32>
    %c0_206 = arith.constant 0 : index
    %c0_207 = arith.constant 0 : index
    %503 = vector.load %arg9[%c0_206, %c0_207] : memref<1x64xf32, #tpu.memory_space<vmem>>, vector<1x64xf32>
    %504 = vector.broadcast %503 : vector<1x64xf32> to vector<8x64xf32>
    %505 = arith.mulf %502, %504 : vector<8x64xf32>
    %cst_208 = arith.constant dense<0.000000e+00> : vector<8xf32>
    %506 = vector.multi_reduction <add>, %505, %cst_208 [1] : vector<8x64xf32> to vector<8xf32>
    %507 = vector.shape_cast %506 : vector<8xf32> to vector<8x1xf32>
    %c0_209 = arith.constant 0 : index
    %c0_210 = arith.constant 0 : index
    %508 = vector.load %arg10[%c0_209, %c0_210] : memref<1x1xf32, #tpu.memory_space<vmem>>, vector<1x1xf32>
    %509 = vector.broadcast %508 : vector<1x1xf32> to vector<8x1xf32>
    %510 = arith.addf %507, %509 : vector<8x1xf32>
    %c0_211 = arith.constant 0 : index
    %c0_212 = arith.constant 0 : index
    %511 = vector.load %arg11[%c0_211, %c0_212] : memref<8x1xf32, #tpu.memory_space<vmem>>, vector<8x1xf32>
    tpu.vector_store %arg11[%c0_211, %c0_212], %510 {strides = array<i32>} : memref<8x1xf32, #tpu.memory_space<vmem>>, vector<8x1xf32>,
    %512 = arith.negf %510 : vector<8x1xf32>
    %513 = math.exp %512 : vector<8x1xf32>
    %cst_213 = arith.constant 1.000000e+00 : f32
    %514 = vector.broadcast %cst_213 : f32 to vector<8x1xf32>
    %515 = arith.addf %514, %513 : vector<8x1xf32>
    %516 = arith.divf %514, %515 : vector<8x1xf32>
    %c0_214 = arith.constant 0 : index
    %c0_215 = arith.constant 0 : index
    %517 = vector.load %arg12[%c0_214, %c0_215] : memref<8x1xf32, #tpu.memory_space<vmem>>, vector<8x1xf32>
    tpu.vector_store %arg12[%c0_214, %c0_215], %516 {strides = array<i32>} : memref<8x1xf32, #tpu.memory_space<vmem>>, vector<8x1xf32>,
    return
  }
  func.func @transform_0(%arg0: i32, %arg1: memref<8x3xi32, #tpu.memory_space<smem>>) -> (i32, i32) {
    %c0_i32 = arith.constant 0 : i32
    %c0_i32_0 = arith.constant 0 : i32
    %c0_i32_1 = arith.constant 0 : i32
    return %c0_i32, %c0_i32_0 : i32, i32
  }
  func.func @transform_1(%arg0: i32, %arg1: memref<8x3xi32, #tpu.memory_space<smem>>) -> (i32, i32) {
    %c0_i32 = arith.constant 0 : i32
    %c0_i32_0 = arith.constant 0 : i32
    %c0_i32_1 = arith.constant 0 : i32
    return %c0_i32, %c0_i32_0 : i32, i32
  }
  func.func @transform_2(%arg0: i32, %arg1: memref<8x3xi32, #tpu.memory_space<smem>>) -> (i32, i32) {
    %c0_i32 = arith.constant 0 : i32
    %c0_i32_0 = arith.constant 0 : i32
    %c0_i32_1 = arith.constant 0 : i32
    return %c0_i32, %c0_i32_0 : i32, i32
  }
  func.func @transform_3(%arg0: i32, %arg1: memref<8x3xi32, #tpu.memory_space<smem>>) -> (i32, i32) {
    %c0_i32 = arith.constant 0 : i32
    %c0_i32_0 = arith.constant 0 : i32
    %c0_i32_1 = arith.constant 0 : i32
    return %c0_i32, %c0_i32_0 : i32, i32
  }
  func.func @transform_4(%arg0: i32, %arg1: memref<8x3xi32, #tpu.memory_space<smem>>) -> (i32, i32) {
    %c0_i32 = arith.constant 0 : i32
    %c0_i32_0 = arith.constant 0 : i32
    %c0_i32_1 = arith.constant 0 : i32
    return %c0_i32, %c0_i32_0 : i32, i32
  }
  func.func @transform_5(%arg0: i32, %arg1: memref<8x3xi32, #tpu.memory_space<smem>>) -> (i32, i32) {
    %c0_i32 = arith.constant 0 : i32
    %c0_i32_0 = arith.constant 0 : i32
    %c0_i32_1 = arith.constant 0 : i32
    return %c0_i32, %c0_i32_0 : i32, i32
  }
  func.func @transform_6(%arg0: i32, %arg1: memref<8x3xi32, #tpu.memory_space<smem>>) -> (i32, i32) {
    %c0_i32 = arith.constant 0 : i32
    %c0_i32_0 = arith.constant 0 : i32
    %c0_i32_1 = arith.constant 0 : i32
    return %c0_i32, %c0_i32_0 : i32, i32
  }
  func.func @transform_7(%arg0: i32, %arg1: memref<8x3xi32, #tpu.memory_space<smem>>) -> (i32, i32) {
    %c0_i32 = arith.constant 0 : i32
    %c0_i32_0 = arith.constant 0 : i32
    %c0_i32_1 = arith.constant 0 : i32
    return %c0_i32, %c0_i32_0 : i32, i32
  }
  func.func @transform_8(%arg0: i32, %arg1: memref<8x3xi32, #tpu.memory_space<smem>>) -> (i32, i32) {
    %c0_i32 = arith.constant 0 : i32
    %c0_i32_0 = arith.constant 0 : i32
    %c0_i32_1 = arith.constant 0 : i32
    return %c0_i32, %c0_i32_0 : i32, i32
  }
  func.func @transform_9(%arg0: i32, %arg1: memref<8x3xi32, #tpu.memory_space<smem>>) -> (i32, i32) {
    %c0_i32 = arith.constant 0 : i32
    %c0_i32_0 = arith.constant 0 : i32
    %c0_i32_1 = arith.constant 0 : i32
    return %c0_i32, %c0_i32_0 : i32, i32
  }
  func.func @transform_10(%arg0: i32, %arg1: memref<8x3xi32, #tpu.memory_space<smem>>) -> (i32, i32) {
    %c0_i32 = arith.constant 0 : i32
    %c0_i32_0 = arith.constant 0 : i32
    %c0_i32_1 = arith.constant 0 : i32
    return %c0_i32, %c0_i32_0 : i32, i32
  }
}

</mosaic_0001>

<bundles_post_ra>
// kernel: student_model_forward.1
= control target key start
LH: loop header
LB: loop body
LE: loop exit
PB: predicated region body
PF: predicated region fallthrough
CT: control target
= control target key end

     0   :  { %s3295_s0 = inlined_call_operand.vmem [shape: s32[8,3], index: 0, kind: input, shape index: {}]   ;;  %s3296_s1 = inlined_call_operand.vmem [shape: f32[64,32], index: 1, kind: input, shape index: {}]   ;;  %s3297_s2 = inlined_call_operand.vmem [shape: f32[32,256], index: 2, kind: input, shape index: {}]   ;;  %s3298_s3 = inlined_call_operand.vmem [shape: f32[1,256], index: 3, kind: input, shape index: {}]   ;;  %s3299_s4 = inlined_call_operand.vmem [shape: f32[32,128], index: 4, kind: input, shape index: {}]   ;;  %s3300_s5 = inlined_call_operand.vmem [shape: f32[32,128], index: 5, kind: input, shape index: {}]   ;;  %s3301_s6 = inlined_call_operand.vmem [shape: f32[64,64], index: 6, kind: input, shape index: {}]   ;;  %s3302_s7 = inlined_call_operand.vmem [shape: f32[1,64], index: 7, kind: input, shape index: {}]   ;;  %s3303_s8 = inlined_call_operand.vmem [shape: f32[1,64], index: 8, kind: input, shape index: {}]   ;;  %s3304_s10 = inlined_call_operand.vmem [shape: f32[8,1], index: 10, kind: output, shape index: {0}]   ;;  %s3305_s11 = inlined_call_operand.vmem [shape: f32[8,1], index: 11, kind: output, shape index: {1}]   ;;  %s3306_s9 = inlined_call_operand.<no memory space> [shape: f32[1,1], index: 9, kind: input, shape index: {}]  }
   0x1   :  { %3307 = sst [smem:[#allocation8_spill]] %s3305_s11  ;;  %s17_s19 = sshll.u32 %s3295_s0, 4  ;;  %v21_v0 = vstv %s3306_s9  ;;  %s18_s19 = int_to_ptr.vmem [resolvable:$true] %s17_s19 }
   0x2   :  { %22 = vst [vmem:[#allocation6] sm:$0x1] %v21_v0  ;;  %s2622_s22 = scalar_lea.vmem %s18_s19, 128  ;;  %p2627_p1 = scmp.lt.s32.totalorder %s18_s19, %s18_s19 }
   0x3   :  { %p2623_p0 = scmp.ne.s32.totalorder %s18_s19, %s2622_s22  ;;  %p2628_p2 = scmp.lt.s32.totalorder %s2622_s22, %s2622_s22 }
   0x5   :  { %p2629_p3 = por %p2628_p2, %p2627_p1 }
   0x7   :  { %p2630_p4 = pnand %p2629_p3, %p2623_p0 }
   0x9   :  { %2633 = shalt.err (!%p2630_p4)  }
   0xa   :  { %s2636_s23 = smov [#allocation5]  }
   0xb   :  { %20 = dma.vmem_to_smem %s18_s19, 128, %s2636_s23, [#allocation4] }
   0xc   :  { %2634 = dma.done.wait [#allocation4], 128 }
   0xd   :  { %2635 = vsyncadd [#allocation4], 4294967168 }
   0xe   :  { %24 = sfence }
   0xf   :  { %v58_v1 = vld [vmem:[%s3297_s2 + $0x38] sm:$0xff]  ;;  %v57_v2 = vld [vmem:[%s3297_s2 + $0x30] sm:$0xff]  ;;  %v56_v3 = vld [vmem:[%s3297_s2 + $0x28] sm:$0xff]  ;;  %v2637_v8 = vmov 0.0   ;;  %vm71_vm0 = vcmask 261120   ;;  %vm2638_vm1 = vmmov 0   ;;  %v61_v17 = vlaneseq }
  0x10   :  { %2509 = vmatprep.subr.mxu1 %v58_v1  ;;  %v55_v4 = vld [vmem:[%s3297_s2 + $0x20] sm:$0xff]  ;;  %120 = vmatprep.subr.mxu0 %v58_v1  ;;  %v54_v5 = vld [vmem:[%s3297_s2 + $0x18] sm:$0xff]  ;;  %v53_v6 = vld [vmem:[%s3297_s2 + $0x10] sm:$0xff]  ;;  %s2640_s12 = smov 32   ;;  %vm1149_vm2 = vcmask 523520   ;;  %s3199_s21 = sld [smem:[#allocation5]] }
  0x11   :  { %2513 = vmatpush1.msra.mxu1 %v57_v2  ;;  %121 = vmatpush1.msra.mxu0 %v57_v2  ;;  %v52_v7 = vld [vmem:[%s3297_s2 + $0x8] sm:$0xff]  ;;  %v51_v9 = vld [vmem:[%s3297_s2] sm:$0xff]  ;;  %v49_v10 = vld [vmem:[%s3296_s1 + $0x30] sm:$0xff]  ;;  %v2798_v18 = vshrl.u32 %v61_v17, 7  ;;  %s3201_s22 = sld [smem:[#allocation5 + $0x2]]  ;;  %vm1895_vm3 = vcmask 516096  }
  0x12   :  { %2510 = vmatprep.subr.mxu1 %v56_v3  ;;  %122 = vmatprep.subr.mxu0 %v56_v3  ;;  %v2738_v11 = vld [vmem:[%s3299_s4 + $0x18] sm:$0xff]  ;;  %v2745_v12 = vld [vmem:[%s3299_s4 + $0x10] sm:$0xff]  ;;  %v43_v14 = vld [vmem:[%s3296_s1] sm:$0xff]  ;;  %s3208_s23 = sld [smem:[#allocation5 + $0x100]]  ;;  %vm1906_vm4 = vcmask 517121   ;;  %vm1917_vm5 = vcmask 518146  }
  0x13   :  { %2514 = vmatpush1.msra.mxu1 %v55_v4  ;;  %196 = vmatprep.mubr.f32.mxu1 %v2637_v8  ;;  %v50_v13 = vld [vmem:[%s3296_s1 + $0x38] sm:$0xff]  ;;  %v2759_v15 = vld [vmem:[%s3299_s4 + $0x8] sm:$0xff]  ;;  %v2768_v16 = vld [vmem:[%s3299_s4] sm:$0xff]  ;;  %v63_v19 = vsub.s32 0, %v2798_v18  ;;  %s3210_s24 = sld [smem:[#allocation5 + $0x102]]  ;;  %vm1928_vm6 = vcmask 519171  }
  0x14   :  { %2511 = vmatprep.subr.mxu1 %v54_v5  ;;  %123 = vmatpush1.msra.mxu0 %v55_v4  ;;  %v2806_v21 = vld [vmem:[%s3298_s3] sm:$0x3]  ;;  %s2639_s3 = smov 64   ;;  %v44_v42 = vld [vmem:[%s3296_s1 + $0x8] sm:$0xff]  ;;  %v45_v0 = vld [vmem:[%s3296_s1 + $0x10] sm:$0xff]  ;;  %s3212_s0 = sld [smem:[#allocation5 + $0x180]] }
  0x15   :  { %2515 = vmatpush1.msra.mxu1 %v53_v6  ;;  %124 = vmatprep.subr.mxu0 %v54_v5  ;;  %v2811_v23 = vrot.slane %v2806_v21, %v63_v19  ;;  %s3215_s9 = sld [smem:[#allocation5 + $0x182]]  ;;  %vm1939_vm7 = vcmask 520196   ;;  %vm1950_vm8 = vcmask 521221   ;;  %vm1961_vm9 = vcmask 522246  }
  0x16   :  { %2512 = vmatprep.subr.mxu1 %v52_v7  ;;  %125 = vmatpush1.msra.mxu0 %v53_v6  ;;  %s2190_s2 = sshll.u32 %s3199_s21, 3  ;;  %s3221_s28 = sld [smem:[#allocation5 + $0x202]]  ;;  %vm1972_vm10 = vcmask 523271   ;;  %vm1990_vm11 = vcmask 523264   ;;  %vm2086_vm13 = vcmask 7168  }
  0x17   :  { %2516 = vmatpush1.msra.mxu1 %v51_v9  ;;  %126 = vmatprep.subr.mxu0 %v52_v7  ;;  %s3223_s29 = sld [smem:[#allocation5 + $0x280]]  ;;  %s1889_s16 = scalar_lea.vmem [#allocation2], %s2190_s2 }
  0x18   :  { %2141 = vmatmul.mubr.msk.f32.vlgmr.msra.gmra.mxu1 %vm71_vm0, %v49_v10  ;;  %2314 = vmatprep.subr.mxu1 %v2637_v8  ;;  %s3225_s4 = sld [smem:[#allocation5 + $0x282]]  ;;  %s3308_s11 = sshll.u32 %s3201_s22, 3 }
  0x19   :  { %2315 = vmatpush3.msra.mxu1 %v2738_v11  ;;  %202 = vmatprep.mubr.f32.mxu1 %v2637_v8  ;;  %s3227_s30 = sld [smem:[#allocation5 + $0x300]]  ;;  %s2199_s14 = sshll.u32 %s3210_s24, 3 }
  0x1a   :  { %2316 = vmatprep.subr.mxu1 %v2637_v8  ;;  %127 = vmatpush1.msra.mxu0 %v51_v9  ;;  %s3230_s13 = sld [smem:[#allocation5 + $0x302]]  ;;  %s1892_s18 = scalar_lea.vmem [#allocation2], %s3308_s11 }
  0x1b   :  { %2317 = vmatpush3.msra.mxu1 %v2745_v12  ;;  %160 = vmatprep.mubr.f32.mxu0 %v2637_v8  ;;  %s3233_s15 = sld [smem:[#allocation5 + $0x380]]  ;;  %s1914_s21 = scalar_lea.vmem [#allocation2], %s2199_s14 }
  0x1c   :  { %2142 = vmatmul.mubr.msk.f32.gmra.mxu1 %vm71_vm0, %v50_v13  ;;  %2318 = vmatprep.subr.mxu1 %v2637_v8  ;;  %s3236_s17 = sld [smem:[#allocation5 + $0x382]]  ;;  %s3311_s11 = sshll.u32 %s3212_s0, 3 }
  0x1d   :  { %2135 = vmatmul.mubr.msk.f32.vlgmr.msra.gmra.mxu0 %vm71_vm0, %v43_v14  ;;  %2319 = vmatpush3.msra.mxu1 %v2759_v15  ;;  %s2210_s20 = sshll.u32 %s3223_s29, 3  ;;  %s1922_s22 = scalar_lea.vmem [#allocation2], %s3311_s11 }
  0x1e   :  { %2320 = vmatprep.subr.mxu1 %v2637_v8  ;;  %2322 = vmatprep.mubr.msk.f32.mxu1 %vm2638_vm1, %v2637_v8  ;;  %s1944_s0 = scalar_lea.vmem [#allocation2], %s2210_s20 }
  0x1f   :  { %2321 = vmatpush3.msra.mxu1 %v2768_v16  ;;  %166 = vmatprep.mubr.f32.mxu0 %v2637_v8 }
  0x20   :  { %2323 = vmatmul.mubr.f32.vlgmr.msra.gmra.mxu1 %v2637_v8  ;;  %2325 = vmatprep.subr.mxu1 %v2637_v8 }
  0x21   :  { %2326 = vmatpush3.msra.mxu1 %v2738_v11  ;;  %2333 = vmatprep.mubr.msk.f32.mxu1 %vm2638_vm1, %v2637_v8  ;;  %s3317_s29 = sshll.u32 %s3233_s15, 3 }
  0x22   :  { %2327 = vmatprep.subr.mxu1 %v2637_v8  ;;  %2358 = vmatprep.subr.mxu0 %v2637_v8  ;;  %s2219_s25 = sshll.u32 %s3236_s17, 3 }
  0x23   :  { %2328 = vmatpush3.msra.mxu1 %v2745_v12  ;;  %2359 = vmatpush3.msra.mxu0 %v2738_v11 }
  0x24   :  { %2329 = vmatprep.subr.mxu1 %v2637_v8  ;;  %2360 = vmatprep.subr.mxu0 %v2637_v8 }
  0x25   :  { %2330 = vmatpush3.msra.mxu1 %v2759_v15  ;;  %2361 = vmatpush3.msra.mxu0 %v2745_v12 }
  0x26   :  { %2331 = vmatprep.subr.mxu1 %v2637_v8  ;;  %2362 = vmatprep.subr.mxu0 %v2637_v8 }
  0x27   :  { %2332 = vmatpush3.msra.mxu1 %v2768_v16  ;;  %2363 = vmatpush3.msra.mxu0 %v2759_v15 }
  0x28   :  { %2336 = vmatprep.subr.mxu1 %v2637_v8  ;;  %2364 = vmatprep.subr.mxu0 %v2637_v8 }
  0x29   :  { %2365 = vmatpush3.msra.mxu0 %v2768_v16 }
  0x2a   :  { %2380 = vmatprep.subr.mxu0 %v2637_v8  ;;  %2136 = vmatmul.mubr.msk.f32.gmra.mxu0 %vm71_vm0, %v44_v42 }
  0x2b   :  { %172 = vmatprep.mubr.f32.mxu0 %v2637_v8 }
  0x2e   :  { %2137 = vmatmul.mubr.msk.f32.gmra.mxu0 %vm71_vm0, %v45_v0 }
  0x2f   :  { %178 = vmatprep.mubr.f32.mxu0 %v2637_v8 }
  0xd8   :  { %v2801_v20 = vpop.f32.mrf.mxu1 }
  0xda   :  { %v2808_v22 = vpop.f32.mrf.mxu1 }
  0xdc   :  { %v2813_v24 = vpop.f32.mrf.mxu1 }
  0xdd   :  { %v162_v25 = vpop.f32.mrf.mxu0 }
  0xde   :  { %v163_v26 = vadd.f32 %v162_v25, %v2811_v23  ;;  %v2816_v27 = vpop.f32.mrf.mxu1 }
  0xdf   :  { %v2839_v47 = vpop.f32.mrf.mxu0 }
  0xe0   :  { %v286_v28 = vpop.f32.mrf.mxu1 }
  0xe1   :  { %v290_v29 = vadd.f32 %v286_v28, %v163_v26 }
  0xe2   :  { %v2324_v30 = vpop.f32.mrf.mxu1 }
  0xe3   :  { %v2143_v31 = vmul.f32 -1.442695, %v290_v29 }
  0xe5   :  { %2522 = vpow2.f32 %v2143_v31 }
  0xea   :  { %v168_v48 = vpop.f32.mrf.mxu0 }
  0xeb   :  { %v169_v49 = vadd.f32 %v168_v48, %v2811_v23 }
  0xec   :  { %v2863_v5 = vpop.f32.mrf.mxu0 }
  0xee   :  { %v174_v6 = vpop.f32.mrf.mxu0 }
  0xef   :  { %v175_v7 = vadd.f32 %v174_v6, %v2811_v23 }
  0xf2   :  { %v2523_v32 = vpop.eup %2522 }
  0xf3   :  { %v294_v33 = vadd.f32 1.0, %v2523_v32 }
  0xf5   :  { %2524 = vrcp.f32 %v294_v33 }
 0x102   :  { %v2525_v34 = vpop.eup %2524 }
 0x103   :  { %v297_v35 = vmul.f32 2.0, %v2525_v34  ;;  %v299_v39 = vmul.f32 0.0, %v2525_v34 }
 0x105   :  { %v2144_v36 = vadd.f32 -1.0, %v297_v35 }
 0x107   :  { %301 = vrot.lane.b32.xlu0 %v2144_v36, %s2639_s3 }
 0x179   :  { %v302_v37 = vpop.permute.xlu0 %301 }
 0x17a   :  { %v304_v38 = vmul.f32 %v2525_v34, %v302_v37 }
 0x17c   :  { %306 = vrot.lane.b32.xlu0 %v304_v38, %s2640_s12 }
 0x1ee   :  { %v307_v40 = vpop.permute.xlu0 %306 }
 0x1ef   :  { %v309_v41 = vadd.f32 %v307_v40, %v299_v39  ;;  %v2887_v39 = vpop.f32.mrf.mxu0 }
 0x1f1   :  { %2526 = vtanh.f32 %v309_v41 }
 0x1fe   :  { %v2527_v43 = vpop.eup %2526 }
 0x1ff   :  { %312 = vrot.lane.b32.xlu1 %v2527_v43, %s2639_s3 }
 0x271   :  { %v313_v44 = vpop.permute.xlu1 %312 }
 0x272   :  { %v315_v45 = vmul.f32 %v2525_v34, %v313_v44  ;;  %v46_v34 = vld [vmem:[%s3296_s1 + $0x18] sm:$0xff] }
 0x273   :  { %2138 = vmatmul.mubr.msk.f32.gmra.mxu0 %vm71_vm0, %v46_v34 }
 0x274   :  { %317 = vrot.lane.b32.xlu1 %v315_v45, %s2640_s12  ;;  %184 = vmatprep.mubr.f32.mxu0 %v2637_v8 }
 0x2e6   :  { %v318_v46 = vpop.permute.xlu1 %317 }
 0x2e7   :  { %320 = vst.msk [vmem:[#allocation2] sm:$0xff] %vm71_vm0, %v318_v46  ;;  %2334 = vmatmul.mubr.msk.f32.vlgmr.msra.gmra.mxu1 %vm71_vm0, %v318_v46 }
 0x2e8   :  { %2337 = vmatpush3.msra.mxu1 %v2738_v11  ;;  %2344 = vmatprep.mubr.msk.f32.mxu1 %vm2638_vm1, %v2637_v8 }
 0x2e9   :  { %2338 = vmatprep.subr.mxu1 %v2637_v8 }
 0x2ea   :  { %2339 = vmatpush3.msra.mxu1 %v2745_v12 }
 0x2eb   :  { %2340 = vmatprep.subr.mxu1 %v2637_v8 }
 0x2ec   :  { %2341 = vmatpush3.msra.mxu1 %v2759_v15 }
 0x2ed   :  { %2342 = vmatprep.subr.mxu1 %v2637_v8 }
 0x2ee   :  { %2343 = vmatpush3.msra.mxu1 %v2768_v16 }
 0x2ef   :  { %2347 = vmatprep.subr.mxu1 %v2637_v8 }
 0x333   :  { %v180_v40 = vpop.f32.mrf.mxu0 }
 0x3a7   :  { %v389_v50 = vpop.f32.mrf.mxu1 }
 0x3a8   :  { %v393_v51 = vadd.f32 %v389_v50, %v169_v49 }
 0x3a9   :  { %v2335_v52 = vpop.f32.mrf.mxu1 }
 0x3aa   :  { %v2146_v53 = vmul.f32 -1.442695, %v393_v51 }
 0x3ac   :  { %2528 = vpow2.f32 %v2146_v53 }
 0x3b9   :  { %v2529_v54 = vpop.eup %2528 }
 0x3ba   :  { %v397_v55 = vadd.f32 1.0, %v2529_v54 }
 0x3bc   :  { %2530 = vrcp.f32 %v397_v55 }
 0x3c9   :  { %v2531_v56 = vpop.eup %2530 }
 0x3ca   :  { %v400_v57 = vmul.f32 2.0, %v2531_v56  ;;  %v402_v61 = vmul.f32 %v2531_v56, %v309_v41  ;;  %v181_v41 = vadd.f32 %v180_v40, %v2811_v23 }
 0x3cc   :  { %v2147_v58 = vadd.f32 -1.0, %v400_v57  ;;  %v47_v57 = vld [vmem:[%s3296_s1 + $0x20] sm:$0xff] }
 0x3cd   :  { %2139 = vmatmul.mubr.msk.f32.gmra.mxu0 %vm71_vm0, %v47_v57  ;;  %v199_v57 = vadd.f32 %v2801_v20, %v2811_v23 }
 0x3ce   :  { %404 = vrot.lane.b32.xlu0 %v2147_v58, %s2639_s3  ;;  %190 = vmatprep.mubr.f32.mxu0 %v2637_v8  ;;  %v48_v58 = vld [vmem:[%s3296_s1 + $0x28] sm:$0xff]  ;;  %s3203_s1 = sld [smem:[#allocation5 + $0x80]] }
 0x3d1   :  { %2140 = vmatmul.mubr.msk.f32.gmra.mxu0 %vm71_vm0, %v48_v58 }
 0x3d2   :  { %2366 = vmatprep.mubr.msk.f32.mxu0 %vm2638_vm1, %v2637_v8 }
 0x440   :  { %v405_v59 = vpop.permute.xlu0 %404 }
 0x441   :  { %v407_v60 = vmul.f32 %v2531_v56, %v405_v59 }
 0x443   :  { %409 = vrot.lane.b32.xlu1 %v407_v60, %s2640_s12 }
 0x4b5   :  { %v410_v62 = vpop.permute.xlu1 %409 }
 0x4b6   :  { %v412_v63 = vadd.f32 %v410_v62, %v402_v61 }
 0x4b8   :  { %2532 = vtanh.f32 %v412_v63 }
 0x4c5   :  { %v2533_v1 = vpop.eup %2532 }
 0x4c6   :  { %415 = vrot.lane.b32.xlu0 %v2533_v1, %s2639_s3 }
 0x538   :  { %v416_v2 = vpop.permute.xlu0 %415 }
 0x539   :  { %v418_v3 = vmul.f32 %v2531_v56, %v416_v2 }
 0x53b   :  { %420 = vrot.lane.b32.xlu1 %v418_v3, %s2640_s12 }
 0x5ad   :  { %v421_v4 = vpop.permute.xlu1 %420 }
 0x5ae   :  { %424 = vst.msk [vmem:[#allocation2 + $0x8] sm:$0xff] %vm71_vm0, %v421_v4  ;;  %2345 = vmatmul.mubr.msk.f32.vlgmr.msra.gmra.mxu1 %vm71_vm0, %v421_v4 }
 0x5af   :  { %2348 = vmatpush3.msra.mxu1 %v2738_v11  ;;  %2355 = vmatprep.mubr.msk.f32.mxu1 %vm2638_vm1, %v2637_v8 }
 0x5b0   :  { %2349 = vmatprep.subr.mxu1 %v2637_v8 }
 0x5b1   :  { %2350 = vmatpush3.msra.mxu1 %v2745_v12 }
 0x5b2   :  { %2351 = vmatprep.subr.mxu1 %v2637_v8 }
 0x5b3   :  { %2352 = vmatpush3.msra.mxu1 %v2759_v15 }
 0x5b4   :  { %2353 = vmatprep.subr.mxu1 %v2637_v8 }
 0x5b5   :  { %2354 = vmatpush3.msra.mxu1 %v2768_v16 }
 0x5b6   :  { %2369 = vmatprep.subr.mxu1 %v2637_v8 }
 0x66e   :  { %v493_v9 = vpop.f32.mrf.mxu1 }
 0x66f   :  { %v497_v10 = vadd.f32 %v493_v9, %v175_v7 }
 0x670   :  { %v2346_v13 = vpop.f32.mrf.mxu1 }
 0x671   :  { %v2149_v14 = vmul.f32 -1.442695, %v497_v10 }
 0x673   :  { %2534 = vpow2.f32 %v2149_v14 }
 0x680   :  { %v2535_v17 = vpop.eup %2534 }
 0x681   :  { %v501_v19 = vadd.f32 1.0, %v2535_v17 }
 0x683   :  { %2536 = vrcp.f32 %v501_v19 }
 0x690   :  { %v2537_v25 = vpop.eup %2536 }
 0x691   :  { %v504_v26 = vmul.f32 2.0, %v2537_v25  ;;  %v506_v31 = vmul.f32 %v2537_v25, %v412_v63  ;;  %v2917_v63 = vpop.f32.mrf.mxu0 }
 0x693   :  { %v2150_v28 = vadd.f32 -1.0, %v504_v26  ;;  %v186_v0 = vpop.f32.mrf.mxu0 }
 0x694   :  { %v187_v4 = vadd.f32 %v186_v0, %v2811_v23 }
 0x695   :  { %508 = vrot.lane.b32.xlu0 %v2150_v28, %s2639_s3  ;;  %v2919_v1 = vpop.f32.mrf.mxu0 }
 0x697   :  { %v192_v2 = vpop.f32.mrf.mxu0 }
 0x699   :  { %v2921_v3 = vpop.f32.mrf.mxu0 }
 0x707   :  { %v509_v29 = vpop.permute.xlu0 %508 }
 0x708   :  { %v511_v30 = vmul.f32 %v2537_v25, %v509_v29 }
 0x70a   :  { %513 = vrot.lane.b32.xlu1 %v511_v30, %s2640_s12 }
 0x77c   :  { %v514_v32 = vpop.permute.xlu1 %513 }
 0x77d   :  { %v516_v33 = vadd.f32 %v514_v32, %v506_v31 }
 0x77f   :  { %2538 = vtanh.f32 %v516_v33 }
 0x78c   :  { %v2539_v35 = vpop.eup %2538 }
 0x78d   :  { %519 = vrot.lane.b32.xlu0 %v2539_v35, %s2639_s3 }
 0x7ff   :  { %v520_v36 = vpop.permute.xlu0 %519 }
 0x800   :  { %v522_v37 = vmul.f32 %v2537_v25, %v520_v36  ;;  %v193_v36 = vadd.f32 %v192_v2, %v2811_v23 }
 0x802   :  { %524 = vrot.lane.b32.xlu1 %v522_v37, %s2640_s12 }
 0x874   :  { %v525_v38 = vpop.permute.xlu1 %524 }
 0x875   :  { %528 = vst.msk [vmem:[#allocation2 + $0x10] sm:$0xff] %vm71_vm0, %v525_v38  ;;  %2356 = vmatmul.mubr.msk.f32.vlgmr.msra.gmra.mxu1 %vm71_vm0, %v525_v38 }
 0x876   :  { %2370 = vmatpush3.msra.mxu1 %v2738_v11  ;;  %2377 = vmatprep.mubr.msk.f32.mxu1 %vm2638_vm1, %v2637_v8 }
 0x877   :  { %2371 = vmatprep.subr.mxu1 %v2637_v8 }
 0x878   :  { %2372 = vmatpush3.msra.mxu1 %v2745_v12 }
 0x879   :  { %2373 = vmatprep.subr.mxu1 %v2637_v8 }
 0x87a   :  { %2374 = vmatpush3.msra.mxu1 %v2759_v15 }
 0x87b   :  { %2375 = vmatprep.subr.mxu1 %v2637_v8 }
 0x87c   :  { %2376 = vmatpush3.msra.mxu1 %v2768_v16 }
 0x87d   :  { %2391 = vmatprep.subr.mxu1 %v2637_v8 }
 0x935   :  { %v597_v42 = vpop.f32.mrf.mxu1 }
 0x936   :  { %v601_v43 = vadd.f32 %v597_v42, %v181_v41 }
 0x937   :  { %v2357_v44 = vpop.f32.mrf.mxu1 }
 0x938   :  { %v2152_v45 = vmul.f32 -1.442695, %v601_v43 }
 0x93a   :  { %2540 = vpow2.f32 %v2152_v45 }
 0x947   :  { %v2541_v46 = vpop.eup %2540 }
 0x948   :  { %v605_v48 = vadd.f32 1.0, %v2541_v46 }
 0x94a   :  { %2542 = vrcp.f32 %v605_v48 }
 0x957   :  { %v2543_v49 = vpop.eup %2542 }
 0x958   :  { %v608_v50 = vmul.f32 2.0, %v2543_v49  ;;  %v610_v54 = vmul.f32 %v2543_v49, %v516_v33 }
 0x95a   :  { %v2153_v51 = vadd.f32 -1.0, %v608_v50 }
 0x95c   :  { %612 = vrot.lane.b32.xlu0 %v2153_v51, %s2639_s3 }
 0x9ce   :  { %v613_v52 = vpop.permute.xlu0 %612 }
 0x9cf   :  { %v615_v53 = vmul.f32 %v2543_v49, %v613_v52  ;;  %v2951_v52 = vld [vmem:[%s3300_s5 + $0x18] sm:$0xff] }
 0x9d1   :  { %617 = vrot.lane.b32.xlu1 %v615_v53, %s2640_s12 }
 0xa43   :  { %v618_v55 = vpop.permute.xlu1 %617 }
 0xa44   :  { %v620_v56 = vadd.f32 %v618_v55, %v610_v54  ;;  %v2958_v54 = vld [vmem:[%s3300_s5 + $0x10] sm:$0xff]  ;;  %v2967_v55 = vld [vmem:[%s3300_s5 + $0x8] sm:$0xff] }
 0xa46   :  { %2544 = vtanh.f32 %v620_v56 }
 0xa53   :  { %v2545_v59 = vpop.eup %2544 }
 0xa54   :  { %623 = vrot.lane.b32.xlu0 %v2545_v59, %s2639_s3  ;;  %v67_v59 = vsub.s32 1, %v2798_v18 }
 0xa56   :  { %v2995_v0 = vrot.slane %v2806_v21, %v67_v59 }
 0xa58   :  { %v207_v2 = vadd.f32 %v2816_v27, %v2995_v0 }
 0xac6   :  { %v624_v60 = vpop.permute.xlu0 %623 }
 0xac7   :  { %v626_v61 = vmul.f32 %v2543_v49, %v624_v60 }
 0xac9   :  { %628 = vrot.lane.b32.xlu1 %v626_v61, %s2640_s12 }
 0xb3b   :  { %v629_v62 = vpop.permute.xlu1 %628 }
 0xb3c   :  { %632 = vst.msk [vmem:[#allocation2 + $0x18] sm:$0xff] %vm71_vm0, %v629_v62  ;;  %2367 = vmatmul.mubr.msk.f32.vlgmr.msra.gmra.mxu0 %vm71_vm0, %v629_v62 }
 0xb3d   :  { %2381 = vmatpush3.msra.mxu0 %v2738_v11  ;;  %2388 = vmatprep.mubr.msk.f32.mxu0 %vm2638_vm1, %v2637_v8 }
 0xb3e   :  { %2382 = vmatprep.subr.mxu0 %v2637_v8 }
 0xb3f   :  { %2383 = vmatpush3.msra.mxu0 %v2745_v12 }
 0xb40   :  { %2384 = vmatprep.subr.mxu0 %v2637_v8 }
 0xb41   :  { %2385 = vmatpush3.msra.mxu0 %v2759_v15 }
 0xb42   :  { %2386 = vmatprep.subr.mxu0 %v2637_v8 }
 0xb43   :  { %2387 = vmatpush3.msra.mxu0 %v2768_v16 }
 0xb44   :  { %2402 = vmatprep.subr.mxu0 %v2637_v8 }
 0xbfc   :  { %v701_v6 = vpop.f32.mrf.mxu0 }
 0xbfd   :  { %v705_v7 = vadd.f32 %v701_v6, %v187_v4 }
 0xbfe   :  { %v2368_v9 = vpop.f32.mrf.mxu0 }
 0xbff   :  { %v2155_v10 = vmul.f32 -1.442695, %v705_v7 }
 0xc01   :  { %2546 = vpow2.f32 %v2155_v10 }
 0xc0e   :  { %v2547_v13 = vpop.eup %2546 }
 0xc0f   :  { %v709_v14 = vadd.f32 1.0, %v2547_v13 }
 0xc11   :  { %2548 = vrcp.f32 %v709_v14 }
 0xc1e   :  { %v2549_v17 = vpop.eup %2548 }
 0xc1f   :  { %v712_v19 = vmul.f32 2.0, %v2549_v17  ;;  %v714_v29 = vmul.f32 %v2549_v17, %v620_v56  ;;  %v2974_v56 = vld [vmem:[%s3300_s5] sm:$0xff]  ;;  %s3218_s5 = sld [smem:[#allocation5 + $0x200]] }
 0xc21   :  { %v2156_v25 = vadd.f32 -1.0, %v712_v19 }
 0xc23   :  { %716 = vrot.lane.b32.xlu0 %v2156_v25, %s2639_s3 }
 0xc95   :  { %v717_v26 = vpop.permute.xlu0 %716 }
 0xc96   :  { %v719_v28 = vmul.f32 %v2549_v17, %v717_v26 }
 0xc98   :  { %721 = vrot.lane.b32.xlu1 %v719_v28, %s2640_s12 }
 0xd0a   :  { %v722_v30 = vpop.permute.xlu1 %721 }
 0xd0b   :  { %v724_v31 = vadd.f32 %v722_v30, %v714_v29 }
 0xd0d   :  { %2550 = vtanh.f32 %v724_v31 }
 0xd1a   :  { %v2551_v32 = vpop.eup %2550 }
 0xd1b   :  { %727 = vrot.lane.b32.xlu0 %v2551_v32, %s2639_s3 }
 0xd8d   :  { %v728_v33 = vpop.permute.xlu0 %727 }
 0xd8e   :  { %v730_v34 = vmul.f32 %v2549_v17, %v728_v33 }
 0xd90   :  { %732 = vrot.lane.b32.xlu1 %v730_v34, %s2640_s12 }
 0xe02   :  { %v733_v35 = vpop.permute.xlu1 %732 }
 0xe03   :  { %736 = vst.msk [vmem:[#allocation2 + $0x20] sm:$0xff] %vm71_vm0, %v733_v35  ;;  %2378 = vmatmul.mubr.msk.f32.vlgmr.msra.gmra.mxu1 %vm71_vm0, %v733_v35 }
 0xe04   :  { %2392 = vmatpush3.msra.mxu1 %v2738_v11  ;;  %2399 = vmatprep.mubr.msk.f32.mxu1 %vm2638_vm1, %v2637_v8 }
 0xe05   :  { %2393 = vmatprep.subr.mxu1 %v2637_v8 }
 0xe06   :  { %2394 = vmatpush3.msra.mxu1 %v2745_v12 }
 0xe07   :  { %2395 = vmatprep.subr.mxu1 %v2637_v8 }
 0xe08   :  { %2396 = vmatpush3.msra.mxu1 %v2759_v15 }
 0xe09   :  { %2397 = vmatprep.subr.mxu1 %v2637_v8 }
 0xe0a   :  { %2398 = vmatpush3.msra.mxu1 %v2768_v16 }
 0xe0b   :  { %2413 = vmatprep.subr.mxu1 %v2637_v8 }
 0xec3   :  { %v805_v11 = vpop.f32.mrf.mxu1 }
 0xec4   :  { %v809_v37 = vadd.f32 %v805_v11, %v193_v36 }
 0xec5   :  { %v2379_v38 = vpop.f32.mrf.mxu1 }
 0xec6   :  { %v2158_v40 = vmul.f32 -1.442695, %v809_v37 }
 0xec8   :  { %2552 = vpow2.f32 %v2158_v40 }
 0xed5   :  { %v2553_v41 = vpop.eup %2552 }
 0xed6   :  { %v813_v42 = vadd.f32 1.0, %v2553_v41 }
 0xed8   :  { %2554 = vrcp.f32 %v813_v42 }
 0xee5   :  { %v2555_v12 = vpop.eup %2554 }
 0xee6   :  { %v816_v43 = vmul.f32 2.0, %v2555_v12  ;;  %v818_v16 = vmul.f32 %v2555_v12, %v724_v31 }
 0xee8   :  { %v2159_v44 = vadd.f32 -1.0, %v816_v43 }
 0xeea   :  { %820 = vrot.lane.b32.xlu0 %v2159_v44, %s2639_s3  ;;  %v205_v44 = vadd.f32 %v2813_v24, %v2811_v23 }
 0xf5c   :  { %v821_v15 = vpop.permute.xlu0 %820 }
 0xf5d   :  { %v823_v45 = vmul.f32 %v2555_v12, %v821_v15 }
 0xf5f   :  { %825 = vrot.lane.b32.xlu1 %v823_v45, %s2640_s12 }
 0xfd1   :  { %v826_v46 = vpop.permute.xlu1 %825 }
 0xfd2   :  { %v2943_v48 = vadd.f32 %v826_v46, %v818_v16  ;;  %v201_v46 = vadd.f32 %v2808_v22, %v2995_v0 }
 0xfd4   :  { %2556 = vtanh.f32 %v2943_v48 }
 0xfe1   :  { %v2557_v49 = vpop.eup %2556 }
 0xfe2   :  { %831 = vrot.lane.b32.xlu0 %v2557_v49, %s2639_s3 }
0x1054   :  { %v832_v50 = vpop.permute.xlu0 %831 }
0x1055   :  { %v834_v51 = vmul.f32 %v2555_v12, %v832_v50 }
0x1057   :  { %836 = vrot.lane.b32.xlu1 %v834_v51, %s2640_s12 }
0x10c9   :  { %v837_v53 = vpop.permute.xlu1 %836 }
0x10ca   :  { %840 = vst.msk [vmem:[#allocation2 + $0x28] sm:$0xff] %vm71_vm0, %v837_v53  ;;  %2389 = vmatmul.mubr.msk.f32.vlgmr.msra.gmra.mxu0 %vm71_vm0, %v837_v53 }
0x10cb   :  { %2403 = vmatpush3.msra.mxu0 %v2951_v52  ;;  %2410 = vmatprep.mubr.msk.f32.mxu0 %vm2638_vm1, %v2637_v8 }
0x10cc   :  { %2404 = vmatprep.subr.mxu0 %v2637_v8 }
0x10cd   :  { %2405 = vmatpush3.msra.mxu0 %v2958_v54 }
0x10ce   :  { %2406 = vmatprep.subr.mxu0 %v2637_v8 }
0x10cf   :  { %2407 = vmatpush3.msra.mxu0 %v2967_v55 }
0x10d0   :  { %2408 = vmatprep.subr.mxu0 %v2637_v8 }
0x10d1   :  { %2409 = vmatpush3.msra.mxu0 %v2974_v56 }
0x10d2   :  { %2411 = vmatmul.mubr.f32.vlgmr.msra.gmra.mxu0 %v2637_v8  ;;  %2424 = vmatprep.subr.mxu0 %v2637_v8 }
0x10d3   :  { %2425 = vmatpush3.msra.mxu0 %v2951_v52  ;;  %2432 = vmatprep.mubr.msk.f32.mxu0 %vm2638_vm1, %v2637_v8 }
0x10d4   :  { %2426 = vmatprep.subr.mxu0 %v2637_v8 }
0x10d5   :  { %2427 = vmatpush3.msra.mxu0 %v2958_v54 }
0x10d6   :  { %2428 = vmatprep.subr.mxu0 %v2637_v8 }
0x10d7   :  { %2429 = vmatpush3.msra.mxu0 %v2967_v55 }
0x10d8   :  { %2430 = vmatprep.subr.mxu0 %v2637_v8 }
0x10d9   :  { %2431 = vmatpush3.msra.mxu0 %v2974_v56 }
0x10da   :  { %2446 = vmatprep.subr.mxu0 %v2637_v8 }
0x118a   :  { %v909_v58 = vpop.f32.mrf.mxu0 }
0x118b   :  { %v913_v60 = vadd.f32 %v909_v58, %v199_v57 }
0x118c   :  { %v2390_v61 = vpop.f32.mrf.mxu0 }
0x118d   :  { %v2161_v62 = vmul.f32 -1.442695, %v913_v60 }
0x118f   :  { %2558 = vpow2.f32 %v2161_v62 }
0x1192   :  { %v1115_v4 = vpop.f32.mrf.mxu0 }
0x1193   :  { %v1119_v6 = vadd.f32 %v1115_v4, %v207_v2 }
0x1194   :  { %v2412_v7 = vpop.f32.mrf.mxu0 }
0x1195   :  { %v2166_v9 = vmul.f32 -1.442695, %v1119_v6 }
0x1197   :  { %2560 = vpow2.f32 %v2166_v9  ;;  %v195_v9 = vadd.f32 %v2921_v3, %v2995_v0 }
0x119c   :  { %v2559_v10 = vpop.eup %2558 }
0x119d   :  { %v917_v20 = vadd.f32 1.0, %v2559_v10 }
0x119f   :  { %2562 = vrcp.f32 %v917_v20 }
0x11a4   :  { %v2561_v13 = vpop.eup %2560 }
0x11a5   :  { %v1123_v18 = vadd.f32 1.0, %v2561_v13 }
0x11a7   :  { %2564 = vrcp.f32 %v1123_v18 }
0x11ac   :  { %v2563_v14 = vpop.eup %2562 }
0x11ad   :  { %v920_v17 = vmul.f32 2.0, %v2563_v14  ;;  %v922_v31 = vmul.f32 %v2563_v14, %v2943_v48 }
0x11af   :  { %v2162_v19 = vadd.f32 -1.0, %v920_v17 }
0x11b1   :  { %924 = vrot.lane.b32.xlu0 %v2162_v19, %s2639_s3 }
0x11b4   :  { %v2565_v21 = vpop.eup %2564 }
0x11b5   :  { %v1126_v25 = vmul.f32 2.0, %v2565_v21  ;;  %v1128_v34 = vmul.f32 0.0, %v2565_v21 }
0x11b7   :  { %v2167_v26 = vadd.f32 -1.0, %v1126_v25 }
0x11b9   :  { %1130 = vrot.lane.b32.xlu1 %v2167_v26, %s2639_s3 }
0x1223   :  { %v925_v27 = vpop.permute.xlu0 %924 }
0x1224   :  { %v927_v28 = vmul.f32 %v2563_v14, %v925_v27 }
0x1226   :  { %929 = vrot.lane.b32.xlu0 %v927_v28, %s2640_s12 }
0x122b   :  { %v1131_v29 = vpop.permute.xlu1 %1130 }
0x122c   :  { %v1133_v30 = vmul.f32 %v2565_v21, %v1131_v29 }
0x122e   :  { %1135 = vrot.lane.b32.xlu1 %v1133_v30, %s2640_s12 }
0x1298   :  { %v930_v32 = vpop.permute.xlu0 %929 }
0x1299   :  { %v3004_v33 = vadd.f32 %v930_v32, %v922_v31 }
0x129b   :  { %2566 = vtanh.f32 %v3004_v33 }
0x12a0   :  { %v1136_v35 = vpop.permute.xlu1 %1135 }
0x12a1   :  { %v1138_v36 = vadd.f32 %v1136_v35, %v1128_v34  ;;  %v189_v35 = vadd.f32 %v2919_v1, %v2995_v0 }
0x12a3   :  { %2568 = vtanh.f32 %v1138_v36 }
0x12a8   :  { %v2567_v11 = vpop.eup %2566 }
0x12a9   :  { %935 = vrot.lane.b32.xlu0 %v2567_v11, %s2639_s3 }
0x12b0   :  { %v2569_v37 = vpop.eup %2568 }
0x12b1   :  { %1141 = vrot.lane.b32.xlu1 %v2569_v37, %s2639_s3 }
0x131b   :  { %v936_v38 = vpop.permute.xlu0 %935 }
0x131c   :  { %v938_v40 = vmul.f32 %v2563_v14, %v936_v38 }
0x131e   :  { %940 = vrot.lane.b32.xlu0 %v938_v40, %s2640_s12 }
0x1323   :  { %v1142_v41 = vpop.permute.xlu1 %1141 }
0x1324   :  { %v3010_v42 = vmul.f32 %v2565_v21, %v1142_v41 }
0x1326   :  { %1151 = vrot.lane.b32.xlu1 %v3010_v42, %s2640_s12 }
0x1390   :  { %v941_v12 = vpop.permute.xlu0 %940 }
0x1391   :  { %944 = vst.msk [vmem:[#allocation2 + $0x30] sm:$0xff] %vm71_vm0, %v941_v12  ;;  %2400 = vmatmul.mubr.msk.f32.vlgmr.msra.gmra.mxu1 %vm71_vm0, %v941_v12 }
0x1392   :  { %2414 = vmatpush3.msra.mxu1 %v2951_v52  ;;  %2421 = vmatprep.mubr.msk.f32.mxu1 %vm2638_vm1, %v2637_v8 }
0x1393   :  { %2415 = vmatprep.subr.mxu1 %v2637_v8 }
0x1394   :  { %2416 = vmatpush3.msra.mxu1 %v2958_v54 }
0x1395   :  { %2417 = vmatprep.subr.mxu1 %v2637_v8 }
0x1396   :  { %2418 = vmatpush3.msra.mxu1 %v2967_v55 }
0x1397   :  { %2419 = vmatprep.subr.mxu1 %v2637_v8 }
0x1398   :  { %2420 = vmatpush3.msra.mxu1 %v2974_v56  ;;  %v1152_v43 = vpop.permute.xlu1 %1151 }
0x1399   :  { %2422 = vmatmul.mubr.msk.f32.vlgmr.msra.gmra.mxu1 %vm71_vm0, %v1152_v43  ;;  %2435 = vmatprep.subr.mxu1 %v2637_v8 }
0x139a   :  { %2436 = vmatpush3.msra.mxu1 %v2951_v52  ;;  %2443 = vmatprep.mubr.msk.f32.mxu1 %vm2638_vm1, %v2637_v8 }
0x139b   :  { %2437 = vmatprep.subr.mxu1 %v2637_v8 }
0x139c   :  { %2438 = vmatpush3.msra.mxu1 %v2958_v54 }
0x139d   :  { %2439 = vmatprep.subr.mxu1 %v2637_v8 }
0x139e   :  { %2440 = vmatpush3.msra.mxu1 %v2967_v55 }
0x139f   :  { %2441 = vmatprep.subr.mxu1 %v2637_v8 }
0x13a0   :  { %2442 = vmatpush3.msra.mxu1 %v2974_v56 }
0x13a1   :  { %2457 = vmatprep.subr.mxu1 %v2637_v8 }
0x1451   :  { %v1013_v15 = vpop.f32.mrf.mxu1 }
0x1452   :  { %v3039_v45 = vadd.f32 %v1013_v15, %v205_v44 }
0x1453   :  { %v2401_v16 = vpop.f32.mrf.mxu1 }
0x1459   :  { %v1221_v48 = vpop.f32.mrf.mxu1 }
0x145a   :  { %v1225_v49 = vadd.f32 %v1221_v48, %v201_v46 }
0x145b   :  { %v2423_v50 = vpop.f32.mrf.mxu1 }
0x145c   :  { %v2169_v51 = vmul.f32 -1.442695, %v1225_v49 }
0x145e   :  { %2570 = vpow2.f32 %v2169_v51 }
0x146b   :  { %v2571_v53 = vpop.eup %2570 }
0x146c   :  { %v1229_v57 = vadd.f32 1.0, %v2571_v53 }
0x146e   :  { %2572 = vrcp.f32 %v1229_v57  ;;  %v183_v57 = vadd.f32 %v2917_v63, %v2995_v0 }
0x147b   :  { %v2573_v58 = vpop.eup %2572 }
0x147c   :  { %v1232_v59 = vmul.f32 2.0, %v2573_v58  ;;  %v1234_v61 = vmul.f32 %v2573_v58, %v1138_v36 }
0x147e   :  { %v2170_v60 = vadd.f32 -1.0, %v1232_v59 }
0x1480   :  { %1236 = vrot.lane.b32.xlu0 %v2170_v60, %s2639_s3 }
0x14f2   :  { %v1237_v23 = vpop.permute.xlu0 %1236 }
0x14f3   :  { %v1239_v24 = vmul.f32 %v2573_v58, %v1237_v23 }
0x14f5   :  { %1241 = vrot.lane.b32.xlu1 %v1239_v24, %s2640_s12 }
0x1567   :  { %v1242_v62 = vpop.permute.xlu1 %1241 }
0x1568   :  { %v1244_v22 = vadd.f32 %v1242_v62, %v1234_v61 }
0x156a   :  { %2574 = vtanh.f32 %v1244_v22 }
0x1577   :  { %v2575_v2 = vpop.eup %2574 }
0x1578   :  { %1247 = vrot.lane.b32.xlu0 %v2575_v2, %s2639_s3 }
0x15ea   :  { %v1248_v4 = vpop.permute.xlu0 %1247 }
0x15eb   :  { %v3046_v6 = vmul.f32 %v2573_v58, %v1248_v4 }
0x15ed   :  { %1256 = vrot.lane.b32.xlu1 %v3046_v6, %s2640_s12 }
0x165f   :  { %v1257_v7 = vpop.permute.xlu1 %1256 }
0x1660   :  { %2433 = vmatmul.mubr.msk.f32.vlgmr.msra.gmra.mxu0 %vm71_vm0, %v1257_v7 }
0x1661   :  { %2447 = vmatpush3.msra.mxu0 %v2951_v52  ;;  %2454 = vmatprep.mubr.msk.f32.mxu0 %vm2638_vm1, %v2637_v8 }
0x1662   :  { %2448 = vmatprep.subr.mxu0 %v2637_v8 }
0x1663   :  { %2449 = vmatpush3.msra.mxu0 %v2958_v54 }
0x1664   :  { %2450 = vmatprep.subr.mxu0 %v2637_v8 }
0x1665   :  { %2451 = vmatpush3.msra.mxu0 %v2967_v55 }
0x1666   :  { %2452 = vmatprep.subr.mxu0 %v2637_v8 }
0x1667   :  { %2453 = vmatpush3.msra.mxu0 %v2974_v56 }
0x1668   :  { %2468 = vmatprep.subr.mxu0 %v2637_v8 }
0x1720   :  { %v1326_v10 = vpop.f32.mrf.mxu0 }
0x1721   :  { %v1330_v20 = vadd.f32 %v1326_v10, %v195_v9 }
0x1722   :  { %v2434_v13 = vpop.f32.mrf.mxu0 }
0x1723   :  { %v2172_v18 = vmul.f32 -1.442695, %v1330_v20 }
0x1725   :  { %2576 = vpow2.f32 %v2172_v18 }
0x1732   :  { %v2577_v14 = vpop.eup %2576 }
0x1733   :  { %v1334_v17 = vadd.f32 1.0, %v2577_v14 }
0x1735   :  { %2578 = vrcp.f32 %v1334_v17  ;;  %v177_v17 = vadd.f32 %v2887_v39, %v2995_v0 }
0x1742   :  { %v2579_v19 = vpop.eup %2578 }
0x1743   :  { %v1337_v21 = vmul.f32 2.0, %v2579_v19  ;;  %v1339_v28 = vmul.f32 %v2579_v19, %v1244_v22 }
0x1745   :  { %v2173_v25 = vadd.f32 -1.0, %v1337_v21 }
0x1747   :  { %1341 = vrot.lane.b32.xlu0 %v2173_v25, %s2639_s3 }
0x17b9   :  { %v1342_v26 = vpop.permute.xlu0 %1341 }
0x17ba   :  { %v1344_v27 = vmul.f32 %v2579_v19, %v1342_v26 }
0x17bc   :  { %1346 = vrot.lane.b32.xlu1 %v1344_v27, %s2640_s12 }
0x182e   :  { %v1347_v29 = vpop.permute.xlu1 %1346 }
0x182f   :  { %v1349_v3 = vadd.f32 %v1347_v29, %v1339_v28 }
0x1831   :  { %2580 = vtanh.f32 %v1349_v3 }
0x183e   :  { %v2581_v30 = vpop.eup %2580 }
0x183f   :  { %1352 = vrot.lane.b32.xlu0 %v2581_v30, %s2639_s3 }
0x18b1   :  { %v1353_v31 = vpop.permute.xlu0 %1352 }
0x18b2   :  { %v3066_v32 = vmul.f32 %v2579_v19, %v1353_v31 }
0x18b4   :  { %1361 = vrot.lane.b32.xlu1 %v3066_v32, %s2640_s12 }
0x1926   :  { %v1362_v34 = vpop.permute.xlu1 %1361 }
0x1927   :  { %2444 = vmatmul.mubr.msk.f32.vlgmr.msra.gmra.mxu1 %vm71_vm0, %v1362_v34 }
0x1928   :  { %2458 = vmatpush3.msra.mxu1 %v2951_v52  ;;  %2465 = vmatprep.mubr.msk.f32.mxu1 %vm2638_vm1, %v2637_v8 }
0x1929   :  { %2459 = vmatprep.subr.mxu1 %v2637_v8 }
0x192a   :  { %2460 = vmatpush3.msra.mxu1 %v2958_v54 }
0x192b   :  { %2461 = vmatprep.subr.mxu1 %v2637_v8 }
0x192c   :  { %2462 = vmatpush3.msra.mxu1 %v2967_v55 }
0x192d   :  { %2463 = vmatprep.subr.mxu1 %v2637_v8 }
0x192e   :  { %2464 = vmatpush3.msra.mxu1 %v2974_v56 }
0x192f   :  { %2479 = vmatprep.subr.mxu1 %v2637_v8 }
0x19e7   :  { %v1431_v36 = vpop.f32.mrf.mxu1 }
0x19e8   :  { %v1435_v11 = vadd.f32 %v1431_v36, %v189_v35 }
0x19e9   :  { %v2445_v37 = vpop.f32.mrf.mxu1 }
0x19ea   :  { %v2175_v38 = vmul.f32 -1.442695, %v1435_v11  ;;  %v171_v11 = vadd.f32 %v2863_v5, %v2995_v0 }
0x19ec   :  { %2582 = vpow2.f32 %v2175_v38 }
0x19f9   :  { %v2583_v40 = vpop.eup %2582 }
0x19fa   :  { %v1439_v41 = vadd.f32 1.0, %v2583_v40 }
0x19fc   :  { %2584 = vrcp.f32 %v1439_v41 }
0x1a09   :  { %v2585_v12 = vpop.eup %2584 }
0x1a0a   :  { %v1442_v43 = vmul.f32 2.0, %v2585_v12  ;;  %v1444_v46 = vmul.f32 %v2585_v12, %v1349_v3 }
0x1a0c   :  { %v2176_v44 = vadd.f32 -1.0, %v1442_v43 }
0x1a0e   :  { %1446 = vrot.lane.b32.xlu0 %v2176_v44, %s2639_s3 }
0x1a80   :  { %v1447_v15 = vpop.permute.xlu0 %1446 }
0x1a81   :  { %v1449_v16 = vmul.f32 %v2585_v12, %v1447_v15 }
0x1a83   :  { %1451 = vrot.lane.b32.xlu1 %v1449_v16, %s2640_s12 }
0x1af5   :  { %v1452_v48 = vpop.permute.xlu1 %1451 }
0x1af6   :  { %v1454_v1 = vadd.f32 %v1452_v48, %v1444_v46 }
0x1af8   :  { %2586 = vtanh.f32 %v1454_v1 }
0x1b05   :  { %v2587_v49 = vpop.eup %2586 }
0x1b06   :  { %1457 = vrot.lane.b32.xlu0 %v2587_v49, %s2639_s3 }
0x1b78   :  { %v1458_v50 = vpop.permute.xlu0 %1457 }
0x1b79   :  { %v3086_v51 = vmul.f32 %v2585_v12, %v1458_v50 }
0x1b7b   :  { %1466 = vrot.lane.b32.xlu1 %v3086_v51, %s2640_s12 }
0x1bed   :  { %v1467_v53 = vpop.permute.xlu1 %1466 }
0x1bee   :  { %2455 = vmatmul.mubr.msk.f32.vlgmr.msra.gmra.mxu0 %vm71_vm0, %v1467_v53 }
0x1bef   :  { %2469 = vmatpush3.msra.mxu0 %v2951_v52  ;;  %2476 = vmatprep.mubr.msk.f32.mxu0 %vm2638_vm1, %v2637_v8 }
0x1bf0   :  { %2470 = vmatprep.subr.mxu0 %v2637_v8 }
0x1bf1   :  { %2471 = vmatpush3.msra.mxu0 %v2958_v54 }
0x1bf2   :  { %2472 = vmatprep.subr.mxu0 %v2637_v8 }
0x1bf3   :  { %2473 = vmatpush3.msra.mxu0 %v2967_v55 }
0x1bf4   :  { %2474 = vmatprep.subr.mxu0 %v2637_v8 }
0x1bf5   :  { %2475 = vmatpush3.msra.mxu0 %v2974_v56 }
0x1bf6   :  { %2490 = vmatprep.subr.mxu0 %v2637_v8 }
0x1cae   :  { %v1536_v58 = vpop.f32.mrf.mxu0 }
0x1caf   :  { %v1540_v59 = vadd.f32 %v1536_v58, %v183_v57 }
0x1cb0   :  { %v2456_v60 = vpop.f32.mrf.mxu0 }
0x1cb1   :  { %v2178_v23 = vmul.f32 -1.442695, %v1540_v59 }
0x1cb3   :  { %2588 = vpow2.f32 %v2178_v23 }
0x1cc0   :  { %v2589_v24 = vpop.eup %2588 }
0x1cc1   :  { %v1544_v61 = vadd.f32 1.0, %v2589_v24 }
0x1cc3   :  { %2590 = vrcp.f32 %v1544_v61 }
0x1cd0   :  { %v2591_v62 = vpop.eup %2590 }
0x1cd1   :  { %v1547_v22 = vmul.f32 2.0, %v2591_v62  ;;  %v1549_v9 = vmul.f32 %v2591_v62, %v1454_v1  ;;  %v2164_v1 = vmul.f32 -1.442695, %v3039_v45 }
0x1cd3   :  { %v2179_v2 = vadd.f32 -1.0, %v1547_v22 }
0x1cd5   :  { %1551 = vrot.lane.b32.xlu0 %v2179_v2, %s2639_s3 }
0x1d47   :  { %v1552_v4 = vpop.permute.xlu0 %1551 }
0x1d48   :  { %v1554_v7 = vmul.f32 %v2591_v62, %v1552_v4 }
0x1d4a   :  { %1556 = vrot.lane.b32.xlu1 %v1554_v7, %s2640_s12 }
0x1dbc   :  { %v1557_v10 = vpop.permute.xlu1 %1556 }
0x1dbd   :  { %v1559_v63 = vadd.f32 %v1557_v10, %v1549_v9 }
0x1dbf   :  { %2592 = vtanh.f32 %v1559_v63 }
0x1dcc   :  { %v2593_v20 = vpop.eup %2592 }
0x1dcd   :  { %1562 = vrot.lane.b32.xlu0 %v2593_v20, %s2639_s3 }
0x1e3f   :  { %v1563_v13 = vpop.permute.xlu0 %1562 }
0x1e40   :  { %v3106_v18 = vmul.f32 %v2591_v62, %v1563_v13 }
0x1e42   :  { %1571 = vrot.lane.b32.xlu1 %v3106_v18, %s2640_s12 }
0x1eb4   :  { %v1572_v14 = vpop.permute.xlu1 %1571 }
0x1eb5   :  { %2466 = vmatmul.mubr.msk.f32.vlgmr.msra.gmra.mxu1 %vm71_vm0, %v1572_v14 }
0x1eb6   :  { %2480 = vmatpush3.msra.mxu1 %v2951_v52  ;;  %2487 = vmatprep.mubr.msk.f32.mxu1 %vm2638_vm1, %v2637_v8 }
0x1eb7   :  { %2481 = vmatprep.subr.mxu1 %v2637_v8 }
0x1eb8   :  { %2482 = vmatpush3.msra.mxu1 %v2958_v54 }
0x1eb9   :  { %2483 = vmatprep.subr.mxu1 %v2637_v8 }
0x1eba   :  { %2484 = vmatpush3.msra.mxu1 %v2967_v55 }
0x1ebb   :  { %2485 = vmatprep.subr.mxu1 %v2637_v8 }
0x1ebc   :  { %2486 = vmatpush3.msra.mxu1 %v2974_v56 }
0x1f75   :  { %v1641_v19 = vpop.f32.mrf.mxu1 }
0x1f76   :  { %v1645_v52 = vadd.f32 %v1641_v19, %v177_v17 }
0x1f77   :  { %v2467_v21 = vpop.f32.mrf.mxu1 }
0x1f78   :  { %v2181_v25 = vmul.f32 -1.442695, %v1645_v52 }
0x1f7a   :  { %2594 = vpow2.f32 %v2181_v25 }
0x1f87   :  { %v2595_v26 = vpop.eup %2594 }
0x1f88   :  { %v1649_v27 = vadd.f32 1.0, %v2595_v26 }
0x1f8a   :  { %2596 = vrcp.f32 %v1649_v27 }
0x1f97   :  { %v2597_v54 = vpop.eup %2596 }
0x1f98   :  { %v1652_v28 = vmul.f32 2.0, %v2597_v54  ;;  %v1654_v56 = vmul.f32 %v2597_v54, %v1559_v63 }
0x1f9a   :  { %v2182_v29 = vadd.f32 -1.0, %v1652_v28 }
0x1f9c   :  { %1656 = vrot.lane.b32.xlu0 %v2182_v29, %s2639_s3 }
0x200e   :  { %v1657_v55 = vpop.permute.xlu0 %1656 }
0x200f   :  { %v1659_v3 = vmul.f32 %v2597_v54, %v1657_v55 }
0x2011   :  { %1661 = vrot.lane.b32.xlu1 %v1659_v3, %s2640_s12 }
0x2083   :  { %v1662_v30 = vpop.permute.xlu1 %1661 }
0x2084   :  { %v1664_v39 = vadd.f32 %v1662_v30, %v1654_v56  ;;  %v1982_v56 = vld [vmem:[%s3301_s6 + $0x38] sm:$0xff]  ;;  %v1981_v30 = vld [vmem:[%s3301_s6 + $0x30] sm:$0xff] }
0x2086   :  { %2598 = vtanh.f32 %v1664_v39 }
0x2093   :  { %v2599_v31 = vpop.eup %2598 }
0x2094   :  { %1667 = vrot.lane.b32.xlu0 %v2599_v31, %s2639_s3 }
0x2106   :  { %v1668_v34 = vpop.permute.xlu0 %1667 }
0x2107   :  { %v1670_v35 = vmul.f32 %v2597_v54, %v1668_v34  ;;  %v1978_v34 = vld [vmem:[%s3301_s6 + $0x18] sm:$0xff] }
0x2109   :  { %1676 = vrot.lane.b32.xlu1 %v1670_v35, %s2640_s12 }
0x217b   :  { %v1677_v36 = vpop.permute.xlu1 %1676 }
0x217c   :  { %2477 = vmatmul.mubr.msk.f32.vlgmr.msra.gmra.mxu0 %vm71_vm0, %v1677_v36  ;;  %v1976_v36 = vld [vmem:[%s3301_s6 + $0x8] sm:$0xff] }
0x217d   :  { %2506 = vmatprep.mubr.msk.f32.mxu0 %vm2638_vm1, %v2637_v8  ;;  %2491 = vmatpush3.msra.mxu0 %v1982_v56 }
0x217e   :  { %2492 = vmatprep.subr.mxu0 %v2637_v8 }
0x217f   :  { %2493 = vmatpush3.msra.mxu0 %v1981_v30 }
0x2180   :  { %2494 = vmatprep.subr.mxu0 %v2637_v8 }
0x223c   :  { %v1746_v37 = vpop.f32.mrf.mxu0 }
0x223d   :  { %v1750_v38 = vadd.f32 %v1746_v37, %v171_v11  ;;  %v1975_v37 = vld [vmem:[%s3301_s6] sm:$0xff] }
0x223e   :  { %v2478_v40 = vpop.f32.mrf.mxu0 }
0x223f   :  { %v2184_v41 = vmul.f32 -1.442695, %v1750_v38 }
0x2241   :  { %2600 = vpow2.f32 %v2184_v41 }
0x224e   :  { %v2601_v12 = vpop.eup %2600 }
0x224f   :  { %v1754_v43 = vadd.f32 1.0, %v2601_v12 }
0x2251   :  { %2602 = vrcp.f32 %v1754_v43 }
0x2252   :  { %2604 = vpow2.f32 %v2164_v1 }
0x225e   :  { %v2603_v44 = vpop.eup %2602 }
0x225f   :  { %v1757_v15 = vmul.f32 2.0, %v2603_v44  ;;  %v2605_v5 = vpop.eup %2604  ;;  %v1759_v50 = vmul.f32 %v2603_v44, %v1664_v39 }
0x2260   :  { %v1021_v49 = vadd.f32 1.0, %v2605_v5 }
0x2261   :  { %v2185_v16 = vadd.f32 -1.0, %v1757_v15 }
0x2262   :  { %2606 = vrcp.f32 %v1021_v49 }
0x2263   :  { %1761 = vrot.lane.b32.xlu0 %v2185_v16, %s2639_s3 }
0x226f   :  { %v2607_v58 = vpop.eup %2606 }
0x2270   :  { %v1024_v59 = vmul.f32 2.0, %v2607_v58  ;;  %v1026_v2 = vmul.f32 %v2607_v58, %v3004_v33  ;;  %v165_v33 = vadd.f32 %v2839_v47, %v2995_v0 }
0x2272   :  { %v2165_v23 = vadd.f32 -1.0, %v1024_v59 }
0x22d5   :  { %v1762_v46 = vpop.permute.xlu0 %1761 }
0x22d6   :  { %v1764_v48 = vmul.f32 %v2603_v44, %v1762_v46 }
0x22d8   :  { %1766 = vrot.lane.b32.xlu1 %v1764_v48, %s2640_s12 }
0x234a   :  { %v1767_v53 = vpop.permute.xlu1 %1766 }
0x234b   :  { %v1769_v57 = vadd.f32 %v1767_v53, %v1759_v50 }
0x234d   :  { %2608 = vtanh.f32 %v1769_v57 }
0x235a   :  { %v2609_v60 = vpop.eup %2608 }
0x235b   :  { %1772 = vrot.lane.b32.xlu0 %v2609_v60, %s2639_s3 }
0x235f   :  { %1028 = vrot.lane.b32.xlu0 %v2165_v23, %s2639_s3 }
0x23cd   :  { %v1773_v24 = vpop.permute.xlu0 %1772 }
0x23ce   :  { %v1775_v61 = vmul.f32 %v2603_v44, %v1773_v24 }
0x23d0   :  { %1781 = vrot.lane.b32.xlu1 %v1775_v61, %s2640_s12 }
0x23d1   :  { %v1029_v45 = vpop.permute.xlu0 %1028 }
0x23d2   :  { %v1031_v62 = vmul.f32 %v2607_v58, %v1029_v45 }
0x23d4   :  { %1033 = vrot.lane.b32.xlu0 %v1031_v62, %s2640_s12 }
0x2442   :  { %v1782_v22 = vpop.permute.xlu1 %1781 }
0x2443   :  { %2488 = vmatmul.mubr.msk.f32.vlgmr.msra.gmra.mxu1 %vm71_vm0, %v1782_v22 }
0x2446   :  { %v1034_v4 = vpop.permute.xlu0 %1033 }
0x2447   :  { %v1036_v7 = vadd.f32 %v1034_v4, %v1026_v2 }
0x2449   :  { %2610 = vtanh.f32 %v1036_v7  ;;  %v2220_v7 = vld [vmem:[%s3302_s7] ss:$0 sm:$0xff] }
0x2456   :  { %v2611_v9 = vpop.eup %2610 }
0x2457   :  { %1039 = vrot.lane.b32.xlu0 %v2611_v9, %s2639_s3 }
0x24c9   :  { %v1040_v10 = vpop.permute.xlu0 %1039 }
0x24ca   :  { %v1042_v63 = vmul.f32 %v2607_v58, %v1040_v10 }
0x24cc   :  { %1044 = vrot.lane.b32.xlu0 %v1042_v63, %s2640_s12 }
0x24d0   :  { %1252 = vrot.lane.b32.xlu0 %v3046_v6, %s2639_s3 }
0x24d4   :  { %1462 = vrot.lane.b32.xlu0 %v3086_v51, %s2639_s3 }
0x24d8   :  { %1672 = vrot.lane.b32.xlu0 %v1670_v35, %s2639_s3  ;;  %v1977_v35 = vld [vmem:[%s3301_s6 + $0x10] sm:$0xff] }
0x2503   :  { %v1851_v20 = vpop.f32.mrf.mxu1 }
0x2504   :  { %v1855_v13 = vadd.f32 %v1851_v20, %v165_v33  ;;  %v2222_v20 = vld [vmem:[%s3303_s8] ss:$0 sm:$0xff] }
0x2505   :  { %v2489_v14 = vpop.f32.mrf.mxu1 }
0x2506   :  { %v2187_v17 = vmul.f32 -1.442695, %v1855_v13 }
0x2508   :  { %2612 = vpow2.f32 %v2187_v17 }
0x2515   :  { %v2613_v19 = vpop.eup %2612 }
0x2516   :  { %v1859_v52 = vadd.f32 1.0, %v2613_v19  ;;  %v2223_v19 = vld [vmem:[#allocation6] ss:$0 sm:$0xff] }
0x2518   :  { %2614 = vrcp.f32 %v1859_v52 }
0x2525   :  { %v2615_v21 = vpop.eup %2614 }
0x2526   :  { %v1862_v25 = vmul.f32 2.0, %v2615_v21  ;;  %v1864_v28 = vmul.f32 %v2615_v21, %v1769_v57 }
0x2528   :  { %v2188_v26 = vadd.f32 -1.0, %v1862_v25 }
0x252a   :  { %1866 = vrot.lane.b32.xlu1 %v2188_v26, %s2639_s3 }
0x253e   :  { %v1045_v6 = vpop.permute.xlu0 %1044 }
0x253f   :  { %1048 = vst.msk [vmem:[#allocation2 + $0x38] sm:$0xff] %vm71_vm0, %v1045_v6 }
0x2542   :  { %v1253_v51 = vpop.permute.xlu0 %1252 }
0x2543   :  { %1255 = vst.msk [vmem:[#allocation2 + $0x30] sm:$0xff] %vm1149_vm2, %v1253_v51 }
0x2546   :  { %v1463_v47 = vpop.permute.xlu0 %1462 }
0x2547   :  { %1465 = vst.msk [vmem:[#allocation2 + $0x20] sm:$0xff] %vm1149_vm2, %v1463_v47 }
0x254a   :  { %v1673_v0 = vpop.permute.xlu0 %1672 }
0x254b   :  { %1675 = vst.msk [vmem:[#allocation2 + $0x10] sm:$0xff] %vm1149_vm2, %v1673_v0 }
0x259c   :  { %v1867_v27 = vpop.permute.xlu1 %1866 }
0x259d   :  { %v1869_v54 = vmul.f32 %v2615_v21, %v1867_v27 }
0x259f   :  { %1871 = vrot.lane.b32.xlu1 %v1869_v54, %s2640_s12  ;;  %s2198_s12 = sshll.u32 %s3208_s23, 3  ;;  %s2211_s23 = sshll.u32 %s3225_s4, 3 }
0x25a0   :  { %s1911_s26 = scalar_lea.vmem [#allocation2], %s2198_s12  ;;  %s1969_s4 = scalar_lea.vmem [#allocation2], %s2219_s25 }
0x2611   :  { %v1872_v29 = vpop.permute.xlu1 %1871 }
0x2612   :  { %v1874_v55 = vadd.f32 %v1872_v29, %v1864_v28 }
0x2614   :  { %2616 = vtanh.f32 %v1874_v55 }
0x2621   :  { %v2617_v3 = vpop.eup %2616 }
0x2622   :  { %1877 = vrot.lane.b32.xlu1 %v2617_v3, %s2639_s3 }
0x2626   :  { %1146 = vrot.lane.b32.xlu1 %v3010_v42, %s2639_s3 }
0x262a   :  { %1357 = vrot.lane.b32.xlu1 %v3066_v32, %s2639_s3  ;;  %v1980_v32 = vld [vmem:[%s3301_s6 + $0x28] sm:$0xff] }
0x262b   :  { %2495 = vmatpush3.msra.mxu0 %v1980_v32 }
0x262c   :  { %2496 = vmatprep.subr.mxu0 %v2637_v8 }
0x262e   :  { %1567 = vrot.lane.b32.xlu1 %v3106_v18, %s2639_s3  ;;  %v1979_v18 = vld [vmem:[%s3301_s6 + $0x20] sm:$0xff]  ;;  %s3205_s6 = sld [smem:[#allocation5 + $0x82]] }
0x262f   :  { %2497 = vmatpush3.msra.mxu0 %v1979_v18 }
0x2630   :  { %2498 = vmatprep.subr.mxu0 %v2637_v8 }
0x2631   :  { %2499 = vmatpush3.msra.mxu0 %v1978_v34 }
0x2632   :  { %1777 = vrot.lane.b32.xlu1 %v1775_v61, %s2639_s3  ;;  %2500 = vmatprep.subr.mxu0 %v2637_v8 }
0x2633   :  { %2501 = vmatpush3.msra.mxu0 %v1977_v35 }
0x2634   :  { %2502 = vmatprep.subr.mxu0 %v2637_v8  ;;  %s3310_s24 = sshll.u32 %s3205_s6, 3 }
0x2635   :  { %2503 = vmatpush3.msra.mxu0 %v1976_v36  ;;  %s1903_s27 = scalar_lea.vmem [#allocation2], %s3310_s24 }
0x2636   :  { %2504 = vmatprep.subr.mxu0 %v2637_v8 }
0x2637   :  { %2505 = vmatpush3.msra.mxu0 %v1975_v37 }
0x2694   :  { %v1878_v42 = vpop.permute.xlu1 %1877 }
0x2695   :  { %v1880_v39 = vmul.f32 %v2615_v21, %v1878_v42 }
0x2697   :  { %1882 = vrot.lane.b32.xlu0 %v1880_v39, %s2639_s3  ;;  %s3309_s3 = sshll.u32 %s3203_s1, 3  ;;  %s3312_s1 = sshll.u32 %s3215_s9, 3 }
0x2698   :  { %v1147_v31 = vpop.permute.xlu1 %1146  ;;  %s1900_s19 = scalar_lea.vmem [#allocation2], %s3309_s3  ;;  %s1925_s2 = scalar_lea.vmem [#allocation2], %s3312_s1 }
0x2699   :  { %1150 = vst.msk [vmem:[#allocation2 + $0x38] sm:$0xff] %vm1149_vm2, %v1147_v31  ;;  %s1947_s9 = scalar_lea.vmem [#allocation2], %s2211_s23  ;;  %s1966_s3 = scalar_lea.vmem [#allocation2], %s3317_s29 }
0x269c   :  { %v1358_v11 = vpop.permute.xlu1 %1357 }
0x269d   :  { %1360 = vst.msk [vmem:[#allocation2 + $0x28] sm:$0xff] %vm1149_vm2, %v1358_v11 }
0x26a0   :  { %v1568_v38 = vpop.permute.xlu1 %1567 }
0x26a1   :  { %1570 = vst.msk [vmem:[#allocation2 + $0x18] sm:$0xff] %vm1149_vm2, %v1568_v38 }
0x26a4   :  { %v1778_v40 = vpop.permute.xlu1 %1777 }
0x26a5   :  { %1780 = vst.msk [vmem:[#allocation2 + $0x8] sm:$0xff] %vm1149_vm2, %v1778_v40 }
0x2709   :  { %v1883_v8 = vpop.permute.xlu0 %1882 }
0x270a   :  { %1885 = vst.msk [vmem:[#allocation2] sm:$0xff] %vm1149_vm2, %v1883_v8 }
0x2711   :  { %v1890_v41 = vld [vmem:[%s1889_s16] sm:$0xff]  ;;  %s3313_s16 = sshll.u32 %s3218_s5, 3  ;;  %s3315_s5 = sshll.u32 %s3227_s30, 3 }
0x2712   :  { %v1893_v12 = vld [vmem:[%s1892_s18] sm:$0xff]  ;;  %s1933_s6 = scalar_lea.vmem [#allocation2], %s3313_s16  ;;  %s1955_s12 = scalar_lea.vmem [#allocation2], %s3315_s5 }
0x2713   :  { %v1901_v43 = vld [vmem:[%s1900_s19] sm:$0xff]  ;;  %v1894_v44 = vmul.f32 %v1893_v12, %v1890_v41  ;;  %s3318_s19 = sld [smem:[#allocation8_spill]] }
0x2714   :  { %v1904_v15 = vld [vmem:[%s1903_s27] sm:$0xff] }
0x2715   :  { %v1912_v16 = vld [vmem:[%s1911_s26] sm:$0xff]  ;;  %v1905_v48 = vmul.f32 %v1904_v15, %v1901_v43  ;;  %1896 = vst.msk [vmem:[#allocation3] sm:$0x1] %vm1895_vm3, %v1894_v44  ;;  %s3314_s26 = sshll.u32 %s3221_s28, 3  ;;  %s3316_s28 = sshll.u32 %s3230_s13, 3 }
0x2716   :  { %v1915_v46 = vld [vmem:[%s1914_s21] sm:$0xff]  ;;  %s1936_s27 = scalar_lea.vmem [#allocation2], %s3314_s26  ;;  %s1958_s14 = scalar_lea.vmem [#allocation2], %s3316_s28 }
0x2717   :  { %v1916_v1 = vmul.f32 %v1915_v46, %v1912_v16  ;;  %v1923_v5 = vld [vmem:[%s1922_s22] sm:$0xff]  ;;  %1907 = vst.msk [vmem:[#allocation3] sm:$0x2] %vm1906_vm4, %v1905_v48 }
0x2718   :  { %v1926_v49 = vld [vmem:[%s1925_s2] sm:$0xff] }
0x2719   :  { %v1934_v50 = vld [vmem:[%s1933_s6] sm:$0xff]  ;;  %v1927_v53 = vmul.f32 %v1926_v49, %v1923_v5  ;;  %1918 = vst.msk [vmem:[#allocation3] sm:$0x4] %vm1917_vm5, %v1916_v1 }
0x271a   :  { %v1937_v57 = vld [vmem:[%s1936_s27] sm:$0xff] }
0x271b   :  { %v1945_v58 = vld [vmem:[%s1944_s0] sm:$0xff]  ;;  %v1938_v60 = vmul.f32 %v1937_v57, %v1934_v50  ;;  %1929 = vst.msk [vmem:[#allocation3] sm:$0x8] %vm1928_vm6, %v1927_v53 }
0x271c   :  { %v1948_v59 = vld [vmem:[%s1947_s9] sm:$0xff] }
0x271d   :  { %v1949_v23 = vmul.f32 %v1948_v59, %v1945_v58  ;;  %v1956_v24 = vld [vmem:[%s1955_s12] sm:$0xff]  ;;  %1940 = vst.msk [vmem:[#allocation3] sm:$0x10] %vm1939_vm7, %v1938_v60 }
0x271e   :  { %v1959_v61 = vld [vmem:[%s1958_s14] sm:$0xff] }
0x271f   :  { %v1967_v45 = vld [vmem:[%s1966_s3] sm:$0xff]  ;;  %v1960_v62 = vmul.f32 %v1959_v61, %v1956_v24  ;;  %1951 = vst.msk [vmem:[#allocation3] sm:$0x20] %vm1950_vm8, %v1949_v23 }
0x2720   :  { %v1970_v22 = vld [vmem:[%s1969_s4] sm:$0xff] }
0x2721   :  { %v1971_v2 = vmul.f32 %v1970_v22, %v1967_v45  ;;  %1962 = vst.msk [vmem:[#allocation3] sm:$0x40] %vm1961_vm9, %v1960_v62 }
0x2723   :  { %1973 = vst.msk [vmem:[#allocation3] sm:$0x80] %vm1972_vm10, %v1971_v2 }
0x272a   :  { %v1974_v4 = vld [vmem:[#allocation3] sm:$0xff] }
0x272b   :  { %2507 = vmatmul.mubr.msk.f32.vlgmr.msra.gmra.mxu0 %vm1990_vm11, %v1974_v4 }
0x27eb   :  { %v2060_v9 = vpop.f32.mrf.mxu0 }
0x27ec   :  { %v2061_v10 = vadd.f32 %v2220_v7, %v2060_v9 }
0x27ed   :  { %v2508_v63 = vpop.f32.mrf.mxu0 }
0x27ee   :  { %vm2064_vm12 = vcmp.gt.f32.partialorder %v2061_v10, 0.0  ;;  %v2065_v33 = vmul.f32 0.01, %v2061_v10 }
0x27f0   :  { %v2066_v13 = vsel %vm2064_vm12, %v2061_v10, %v2065_v33 }
0x27f1   :  { %v2074_v14 = vmul.f32 %v2222_v20, %v2066_v13 }
0x27f3   :  { %v2075_v17 = vsel %vm1990_vm11, %v2074_v14, 0.0 }
0x27f4   :  { %2076 = vadd.xlane.f32.xlu1 %v2075_v17 }
0x287d   :  { %v2077_v52 = vpop.xlane.xlu1 %2076 }
0x287e   :  { %v2085_v21 = vadd.f32 %v2223_v19, %v2077_v52 }
0x2880   :  { %2087 = vst.msk [vmem:[%s3304_s10] sm:$0xff] %vm2086_vm13, %v2085_v21  ;;  %v2224_v25 = vmul.f32 -1.442695, %v2085_v21 }
0x2882   :  { %2618 = vpow2.f32 %v2224_v25 }
0x288f   :  { %v2619_v26 = vpop.eup %2618 }
0x2890   :  { %v2091_v6 = vadd.f32 1.0, %v2619_v26 }
0x2892   :  { %2620 = vrcp.f32 %v2091_v6 }
0x289f   :  { %v2621_v51 = vpop.eup %2620 }
0x28a0   :  { %2094 = vst.msk [vmem:[%s3318_s19] sm:$0xff] %vm2086_vm13, %v2621_v51 }

</bundles_post_ra>
